<compile_context>
chip_gen: v5e
topology: v5e:2x2
jax: 0.10.0
libtpu: 0.0.40
codegen_flags: <defaults>
</compile_context>

<pallas_src>
import functools

import jax
import jax.numpy as jnp
from jax.experimental import pallas as pl
from jax.experimental.pallas import tpu as pltpu

IN_FEATURES = 1888
H1, H2, H3 = 256, 128, 64
OUT_FEATURES = 2


def _round_up(x, m):
    return ((x + m - 1) // m) * m


def _mlp_kernel(x_ref,
                w1_ref, b1_ref,
                w2_ref, b2_ref,
                w3_ref, b3_ref,
                w4_ref, b4_ref,
                o_ref):
    # x tile: (TB, 1888) f32 -> cast to bf16 in-kernel (VPU), MXU f32 accumulate.
    x = x_ref[...].astype(jnp.bfloat16)

    # fc1 + ReLU
    h1 = jnp.dot(x, w1_ref[...], preferred_element_type=jnp.float32)
    h1 = jnp.maximum(h1 + b1_ref[...], 0.0)                          # (TB, 256) f32

    # fc2 + ReLU
    h2 = jnp.dot(h1.astype(jnp.bfloat16), w2_ref[...],
                 preferred_element_type=jnp.float32)
    h2 = jnp.maximum(h2 + b2_ref[...], 0.0)                          # (TB, 128) f32

    # fc3 + ReLU
    h3 = jnp.dot(h2.astype(jnp.bfloat16), w3_ref[...],
                 preferred_element_type=jnp.float32)
    h3 = jnp.maximum(h3 + b3_ref[...], 0.0)                          # (TB, 64) f32

    # fc4 + Sigmoid (only the 2 valid output lanes are computed / stored)
    z = jnp.dot(h3.astype(jnp.bfloat16), w4_ref[...],
                preferred_element_type=jnp.float32)
    z = z + b4_ref[...]                                              # (TB, 2) f32
    # sigmoid(z) = 0.5 * (tanh(z/2) + 1)  -- stable, single EUP transcendental.
    o_ref[...] = 0.5 * (jnp.tanh(0.5 * z) + 1.0)


def prepare_params(params):
    """Cast params once for the kernel: bf16 weights (in,out), f32 biases (1,out)."""
    prepared = {}
    for name in ("fc1", "fc2", "fc3", "fc4"):
        w, b = params[name]
        prepared[name] = (w.astype(jnp.bfloat16),
                          b.reshape(1, -1).astype(jnp.float32))
    return prepared


def _cost_estimate(batch):
    mm = IN_FEATURES * H1 + H1 * H2 + H2 * H3 + H3 * OUT_FEATURES
    flops = 2 * batch * mm
    bytes_accessed = (batch * IN_FEATURES * 4          # x (f32 read)
                      + batch * OUT_FEATURES * 4       # output (f32 write)
                      + mm * 2                         # bf16 weights
                      + (H1 + H2 + H3 + OUT_FEATURES) * 4)  # f32 biases
    return pl.CostEstimate(flops=flops,
                           transcendentals=batch * OUT_FEATURES,
                           bytes_accessed=bytes_accessed)


@functools.partial(jax.jit, static_argnames=("tile_b",))
def nn2_forward(x, prepared, tile_b=1024):
    """x: (B, 1888) float32; prepared: output of prepare_params(). Returns (B, 2) f32."""
    B, F = x.shape
    assert F == IN_FEATURES

    w1, b1 = prepared["fc1"]
    w2, b2 = prepared["fc2"]
    w3, b3 = prepared["fc3"]
    w4, b4 = prepared["fc4"]

    # Tile: at most tile_b rows, always a multiple of 8; last block may be partial
    # (Pallas masks it).  For large B this gives >=2 grid steps so the "parallel"
    # batch axis shards across TensorCores on megacore parts.
    tb = min(tile_b, _round_up(B, 8))
    grid = (pl.cdiv(B, tb),)
    const = lambda i: (0, 0)   # weights/biases: single block, VMEM-resident

    out = pl.pallas_call(
        _mlp_kernel,
        out_shape=jax.ShapeDtypeStruct((B, OUT_FEATURES), jnp.float32),
        grid=grid,
        in_specs=[
            pl.BlockSpec((tb, IN_FEATURES), lambda i: (i, 0)),   # x tile (f32)
            pl.BlockSpec((IN_FEATURES, H1), const),              # w1
            pl.BlockSpec((1, H1), const),                        # b1
            pl.BlockSpec((H1, H2), const),                       # w2
            pl.BlockSpec((1, H2), const),                        # b2
            pl.BlockSpec((H2, H3), const),                       # w3
            pl.BlockSpec((1, H3), const),                        # b3
            pl.BlockSpec((H3, OUT_FEATURES), const),             # w4
            pl.BlockSpec((1, OUT_FEATURES), const),              # b4
        ],
        out_specs=pl.BlockSpec((tb, OUT_FEATURES), lambda i: (i, 0)),
        compiler_params=pltpu.CompilerParams(
            dimension_semantics=("parallel",),
            vmem_limit_bytes=48 * 1024 * 1024,
        ),
        cost_estimate=_cost_estimate(B),
    )(x, w1, b1, w2, b2, w3, b3, w4, b4)

    return out


def _init_linear(key, fan_in, fan_out):
    """Mimics torch.nn.Linear default init: U(-1/sqrt(fan_in), +1/sqrt(fan_in))."""
    kw, kb = jax.random.split(key)
    bound = 1.0 / jnp.sqrt(fan_in)
    # Stored as (in, out) so that y = x @ W + b (transpose of PyTorch's (out, in)).
    w = jax.random.uniform(kw, (fan_in, fan_out), jnp.float32, -bound, bound)
    b = jax.random.uniform(kb, (1, fan_out), jnp.float32, -bound, bound)
    return w, b


def init_params(key):
    k1, k2, k3, k4 = jax.random.split(key, 4)
    return {
        "fc1": _init_linear(k1, IN_FEATURES, H1),
        "fc2": _init_linear(k2, H1, H2),
        "fc3": _init_linear(k3, H2, H3),
        "fc4": _init_linear(k4, H3, OUT_FEATURES),
    }


def nn2_reference(x, params):
    """Pure-JAX f32 reference for correctness checking."""
    h = x
    for name in ("fc1", "fc2", "fc3"):
        w, b = params[name]
        h = jnp.maximum(h @ w + b, 0.0)
    w, b = params["fc4"]
    return jax.nn.sigmoid(h @ w + b)


if __name__ == "__main__":
    key = jax.random.PRNGKey(0)
    kp, kx = jax.random.split(key)

    params = init_params(kp)
    prepared = prepare_params(params)

    B = 8   # small smoke-test batch; tiling/bf16 wins show up at B >= 1024
    x = jax.random.normal(kx, (B, IN_FEATURES), jnp.float32)

    out = nn2_forward(x, prepared)
    out = jax.block_until_ready(out)

    ref = nn2_reference(x, params)
    assert out.shape == (B, OUT_FEATURES), out.shape
    # bf16 matmul operands vs f32 reference -> loosened tolerance (sigmoid-bounded).
    max_err = float(jnp.max(jnp.abs(out - ref)))
    assert max_err < 3e-2, f"max abs err {max_err}"

    print("KERNEL_OK")
</pallas_src>

<mosaic_0001>
module attributes {stable_mosaic.version = 11 : i64} {
  func.func @_mlp_kernel(%arg0: i32, %arg1: memref<8x1888xf32, #tpu.memory_space<vmem>>, %arg2: memref<1888x256xbf16, #tpu.memory_space<vmem>>, %arg3: memref<1x256xf32, #tpu.memory_space<vmem>>, %arg4: memref<256x128xbf16, #tpu.memory_space<vmem>>, %arg5: memref<1x128xf32, #tpu.memory_space<vmem>>, %arg6: memref<128x64xbf16, #tpu.memory_space<vmem>>, %arg7: memref<1x64xf32, #tpu.memory_space<vmem>>, %arg8: memref<64x2xbf16, #tpu.memory_space<vmem>>, %arg9: memref<1x2xf32, #tpu.memory_space<vmem>>, %arg10: memref<8x2xf32, #tpu.memory_space<vmem>>) attributes {dimension_semantics = [#tpu.dimension_semantics<parallel>], iteration_bounds = array<i64: 1>, scalar_prefetch = 0 : i64, scratch_operands = 0 : i64, tpu.core_type = #tpu.core_type<tc>, window_params = [{transform_indices = @transform_0, window_bounds = array<i64: 8, 1888>}, {pipeline_mode = #tpu.pipeline_mode<synchronous>, transform_indices = @transform_1, window_bounds = array<i64: 1888, 256>}, {pipeline_mode = #tpu.pipeline_mode<synchronous>, transform_indices = @transform_2, window_bounds = array<i64: 1, 256>}, {pipeline_mode = #tpu.pipeline_mode<synchronous>, transform_indices = @transform_3, window_bounds = array<i64: 256, 128>}, {pipeline_mode = #tpu.pipeline_mode<synchronous>, transform_indices = @transform_4, window_bounds = array<i64: 1, 128>}, {pipeline_mode = #tpu.pipeline_mode<synchronous>, transform_indices = @transform_5, window_bounds = array<i64: 128, 64>}, {pipeline_mode = #tpu.pipeline_mode<synchronous>, transform_indices = @transform_6, window_bounds = array<i64: 1, 64>}, {pipeline_mode = #tpu.pipeline_mode<synchronous>, transform_indices = @transform_7, window_bounds = array<i64: 64, 2>}, {pipeline_mode = #tpu.pipeline_mode<synchronous>, transform_indices = @transform_8, window_bounds = array<i64: 1, 2>}, {transform_indices = @transform_9, window_bounds = array<i64: 8, 2>}]} {
    %c0 = arith.constant 0 : index
    %c0_0 = arith.constant 0 : index
    %0 = vector.load %arg1[%c0, %c0_0] : memref<8x1888xf32, #tpu.memory_space<vmem>>, vector<8x1888xf32>
    %1 = arith.truncf %0 : vector<8x1888xf32> to vector<8x1888xbf16>
    %c0_1 = arith.constant 0 : index
    %c0_2 = arith.constant 0 : index
    %2 = vector.load %arg2[%c0_1, %c0_2] : memref<1888x256xbf16, #tpu.memory_space<vmem>>, vector<1888x256xbf16>
    %cst = arith.constant dense<0.000000e+00> : vector<8x256xf32>
    %3 = tpu.matmul %1, %2, %cst {dimension_numbers = #tpu.dot_dimension_numbers<[1], [0], [0], [1], [0, 0, 1, 1], [], []>} : vector<8x1888xbf16>, vector<1888x256xbf16>, vector<8x256xf32> -> vector<8x256xf32>
    %c0_3 = arith.constant 0 : index
    %c0_4 = arith.constant 0 : index
    %4 = vector.load %arg3[%c0_3, %c0_4] : memref<1x256xf32, #tpu.memory_space<vmem>>, vector<1x256xf32>
    %5 = vector.broadcast %4 : vector<1x256xf32> to vector<8x256xf32>
    %6 = arith.addf %3, %5 : vector<8x256xf32>
    %cst_5 = arith.constant 0.000000e+00 : f32
    %7 = vector.broadcast %cst_5 : f32 to vector<8x256xf32>
    %8 = arith.maximumf %6, %7 : vector<8x256xf32>
    %9 = arith.truncf %8 : vector<8x256xf32> to vector<8x256xbf16>
    %c0_6 = arith.constant 0 : index
    %c0_7 = arith.constant 0 : index
    %10 = vector.load %arg4[%c0_6, %c0_7] : memref<256x128xbf16, #tpu.memory_space<vmem>>, vector<256x128xbf16>
    %cst_8 = arith.constant dense<0.000000e+00> : vector<8x128xf32>
    %11 = tpu.matmul %9, %10, %cst_8 {dimension_numbers = #tpu.dot_dimension_numbers<[1], [0], [0], [1], [0, 0, 1, 1], [], []>} : vector<8x256xbf16>, vector<256x128xbf16>, vector<8x128xf32> -> vector<8x128xf32>
    %c0_9 = arith.constant 0 : index
    %c0_10 = arith.constant 0 : index
    %12 = vector.load %arg5[%c0_9, %c0_10] : memref<1x128xf32, #tpu.memory_space<vmem>>, vector<1x128xf32>
    %13 = vector.broadcast %12 : vector<1x128xf32> to vector<8x128xf32>
    %14 = arith.addf %11, %13 : vector<8x128xf32>
    %cst_11 = arith.constant 0.000000e+00 : f32
    %15 = vector.broadcast %cst_11 : f32 to vector<8x128xf32>
    %16 = arith.maximumf %14, %15 : vector<8x128xf32>
    %17 = arith.truncf %16 : vector<8x128xf32> to vector<8x128xbf16>
    %c0_12 = arith.constant 0 : index
    %c0_13 = arith.constant 0 : index
    %18 = vector.load %arg6[%c0_12, %c0_13] : memref<128x64xbf16, #tpu.memory_space<vmem>>, vector<128x64xbf16>
    %cst_14 = arith.constant dense<0.000000e+00> : vector<8x64xf32>
    %19 = tpu.matmul %17, %18, %cst_14 {dimension_numbers = #tpu.dot_dimension_numbers<[1], [0], [0], [1], [0, 0, 1, 1], [], []>} : vector<8x128xbf16>, vector<128x64xbf16>, vector<8x64xf32> -> vector<8x64xf32>
    %c0_15 = arith.constant 0 : index
    %c0_16 = arith.constant 0 : index
    %20 = vector.load %arg7[%c0_15, %c0_16] : memref<1x64xf32, #tpu.memory_space<vmem>>, vector<1x64xf32>
    %21 = vector.broadcast %20 : vector<1x64xf32> to vector<8x64xf32>
    %22 = arith.addf %19, %21 : vector<8x64xf32>
    %cst_17 = arith.constant 0.000000e+00 : f32
    %23 = vector.broadcast %cst_17 : f32 to vector<8x64xf32>
    %24 = arith.maximumf %22, %23 : vector<8x64xf32>
    %25 = arith.truncf %24 : vector<8x64xf32> to vector<8x64xbf16>
    %c0_18 = arith.constant 0 : index
    %c0_19 = arith.constant 0 : index
    %26 = vector.load %arg8[%c0_18, %c0_19] : memref<64x2xbf16, #tpu.memory_space<vmem>>, vector<64x2xbf16>
    %cst_20 = arith.constant dense<0.000000e+00> : vector<8x2xf32>
    %27 = tpu.matmul %25, %26, %cst_20 {dimension_numbers = #tpu.dot_dimension_numbers<[1], [0], [0], [1], [0, 0, 1, 1], [], []>} : vector<8x64xbf16>, vector<64x2xbf16>, vector<8x2xf32> -> vector<8x2xf32>
    %c0_21 = arith.constant 0 : index
    %c0_22 = arith.constant 0 : index
    %28 = vector.load %arg9[%c0_21, %c0_22] : memref<1x2xf32, #tpu.memory_space<vmem>>, vector<1x2xf32>
    %29 = vector.broadcast %28 : vector<1x2xf32> to vector<8x2xf32>
    %30 = arith.addf %27, %29 : vector<8x2xf32>
    %cst_23 = arith.constant 5.000000e-01 : f32
    %31 = vector.broadcast %cst_23 : f32 to vector<8x2xf32>
    %32 = arith.mulf %31, %30 : vector<8x2xf32>
    %33 = math.tanh %32 : vector<8x2xf32>
    %cst_24 = arith.constant 1.000000e+00 : f32
    %34 = vector.broadcast %cst_24 : f32 to vector<8x2xf32>
    %35 = arith.addf %33, %34 : vector<8x2xf32>
    %cst_25 = arith.constant 5.000000e-01 : f32
    %36 = vector.broadcast %cst_25 : f32 to vector<8x2xf32>
    %37 = arith.mulf %36, %35 : vector<8x2xf32>
    %c0_26 = arith.constant 0 : index
    %c0_27 = arith.constant 0 : index
    %38 = vector.load %arg10[%c0_26, %c0_27] : memref<8x2xf32, #tpu.memory_space<vmem>>, vector<8x2xf32>
    tpu.vector_store %arg10[%c0_26, %c0_27], %37 {strides = array<i32>} : memref<8x2xf32, #tpu.memory_space<vmem>>, vector<8x2xf32>,
    return
  }
  func.func @transform_0(%arg0: i32) -> (i32, i32) {
    %c0_i32 = arith.constant 0 : i32
    %c0_i32_0 = arith.constant 0 : i32
    return %arg0, %c0_i32 : i32, i32
  }
  func.func @transform_1(%arg0: i32) -> (i32, i32) {
    %c0_i32 = arith.constant 0 : i32
    %c0_i32_0 = arith.constant 0 : i32
    %c0_i32_1 = arith.constant 0 : i32
    return %c0_i32, %c0_i32_0 : i32, i32
  }
  func.func @transform_2(%arg0: i32) -> (i32, i32) {
    %c0_i32 = arith.constant 0 : i32
    %c0_i32_0 = arith.constant 0 : i32
    %c0_i32_1 = arith.constant 0 : i32
    return %c0_i32, %c0_i32_0 : i32, i32
  }
  func.func @transform_3(%arg0: i32) -> (i32, i32) {
    %c0_i32 = arith.constant 0 : i32
    %c0_i32_0 = arith.constant 0 : i32
    %c0_i32_1 = arith.constant 0 : i32
    return %c0_i32, %c0_i32_0 : i32, i32
  }
  func.func @transform_4(%arg0: i32) -> (i32, i32) {
    %c0_i32 = arith.constant 0 : i32
    %c0_i32_0 = arith.constant 0 : i32
    %c0_i32_1 = arith.constant 0 : i32
    return %c0_i32, %c0_i32_0 : i32, i32
  }
  func.func @transform_5(%arg0: i32) -> (i32, i32) {
    %c0_i32 = arith.constant 0 : i32
    %c0_i32_0 = arith.constant 0 : i32
    %c0_i32_1 = arith.constant 0 : i32
    return %c0_i32, %c0_i32_0 : i32, i32
  }
  func.func @transform_6(%arg0: i32) -> (i32, i32) {
    %c0_i32 = arith.constant 0 : i32
    %c0_i32_0 = arith.constant 0 : i32
    %c0_i32_1 = arith.constant 0 : i32
    return %c0_i32, %c0_i32_0 : i32, i32
  }
  func.func @transform_7(%arg0: i32) -> (i32, i32) {
    %c0_i32 = arith.constant 0 : i32
    %c0_i32_0 = arith.constant 0 : i32
    %c0_i32_1 = arith.constant 0 : i32
    return %c0_i32, %c0_i32_0 : i32, i32
  }
  func.func @transform_8(%arg0: i32) -> (i32, i32) {
    %c0_i32 = arith.constant 0 : i32
    %c0_i32_0 = arith.constant 0 : i32
    %c0_i32_1 = arith.constant 0 : i32
    return %c0_i32, %c0_i32_0 : i32, i32
  }
  func.func @transform_9(%arg0: i32) -> (i32, i32) {
    %c0_i32 = arith.constant 0 : i32
    %c0_i32_0 = arith.constant 0 : i32
    return %arg0, %c0_i32 : i32, i32
  }
}

</mosaic_0001>

<bundles_post_ra>
// kernel: nn2_forward.1
= control target key start
LH: loop header
LB: loop body
LE: loop exit
PB: predicated region body
PF: predicated region fallthrough
CT: control target
= control target key end

     0   :  { %14 = vsyncpa [#allocation3], 0  ;;  %s3854_s0 = inlined_call_operand.hbm [shape: f32[8,1888], index: 0, kind: input, shape index: {}]   ;;  %s3855_s1 = inlined_call_operand.hbm [shape: bf16[1888,256], index: 1, kind: input, shape index: {}]   ;;  %s3856_s2 = inlined_call_operand.vmem [shape: f32[1,256], index: 2, kind: input, shape index: {}]   ;;  %s3857_s3 = inlined_call_operand.vmem [shape: bf16[256,128], index: 3, kind: input, shape index: {}]   ;;  %s3858_s4 = inlined_call_operand.vmem [shape: f32[1,128], index: 4, kind: input, shape index: {}]   ;;  %s3859_s5 = inlined_call_operand.vmem [shape: bf16[128,64], index: 5, kind: input, shape index: {}]   ;;  %s3860_s6 = inlined_call_operand.vmem [shape: f32[1,64], index: 6, kind: input, shape index: {}]   ;;  %s3861_s7 = inlined_call_operand.vmem [shape: bf16[64,2], index: 7, kind: input, shape index: {}]   ;;  %s3862_s8 = inlined_call_operand.vmem [shape: f32[1,2], index: 8, kind: input, shape index: {}]   ;;  %s3863_s9 = inlined_call_operand.vmem [shape: f32[8,2], index: 9, kind: output, shape index: {}]  }
   0x1   :  { %s21_s11 = sshll.u32 %s3854_s0, 4  ;;  %s22_s11 = int_to_ptr.hbm [resolvable:$true] %s21_s11 }
   0x2   :  { %15 = vsyncpa [#allocation5], 0  ;;  %s3605_s12 = smov [#allocation2]   ;;  %s31_s16 = sshll.u32 %s3855_s1, 4  ;;  %s32_s16 = int_to_ptr.hbm [resolvable:$true] %s31_s16 }
   0x3   :  { %s23_s13 = sshll.u32 %s3605_s12, 4  ;;  %s3606_s17 = smov [#allocation4]   ;;  %s24_s13 = int_to_ptr.vmem [resolvable:$true] %s23_s13 }
   0x4   :  { %26 = dma.hbm_to_vmem [thread:$0]  %s22_s11, 1920, %s24_s13, [#allocation3]  }
   0x5   :  { %s33_s18 = sshll.u32 %s3606_s17, 4  ;;  %s3607_s19 = smov 128   ;;  %s34_s18 = int_to_ptr.vmem [resolvable:$true] %s33_s18 }
   0x6   :  { %s3608_s20 = smov 8  }
   0x7   :  { %39 = dma.hbm_to_vmem [thread:$0]  %s32_s16, 30208, %s34_s18, [#allocation5], %s3607_s19, %s3607_s19, %s3608_s20  }
   0x8   :  { %3601 = dma.done.wait [#allocation3], 1920  }
   0x9   :  { %3602 = vsyncadd [#allocation3], 4294965376 }
   0xa   :  { %3603 = dma.done.wait [#allocation5], 30208  }
   0xb   :  { %3604 = vsyncadd [#allocation5], 4294937088  ;;  %v2279_v0 = vld [vmem:[#allocation4 + $0x70] sm:$0xf]  ;;  %v3295_v1 = vld [vmem:[#allocation4 + $0x74] sm:$0xf0] }
   0xc   :  { %v2407_v2 = vld [vmem:[#allocation4 + $0x170] sm:$0xf]  ;;  %v2280_v3 = vor.u32 %v3295_v1, %v2279_v0  ;;  %v3327_v4 = vld [vmem:[#allocation4 + $0x174] sm:$0xf0]  ;;  %v2271_v11 = vld [vmem:[#allocation4 + $0x60] sm:$0xf] }
   0xd   :  { %v2471_v5 = vld [vmem:[#allocation4 + $0x1f0] sm:$0xf]  ;;  %v3343_v6 = vld [vmem:[#allocation4 + $0x1f4] sm:$0xf0]  ;;  %v2408_v7 = vor.u32 %v3327_v4, %v2407_v2  ;;  %v3293_v13 = vld [vmem:[#allocation4 + $0x64] sm:$0xf0] }
   0xe   :  { %v2472_v8 = vor.u32 %v3343_v6, %v2471_v5  ;;  %v2343_v9 = vld [vmem:[#allocation4 + $0xf0] sm:$0xf]  ;;  %v3311_v10 = vld [vmem:[#allocation4 + $0xf4] sm:$0xf0]  ;;  %1519 = vmatpush.bf16.msra.mxu0 %v2280_v3  ;;  %v2399_v14 = vld [vmem:[#allocation4 + $0x160] sm:$0xf]  ;;  %v2272_v16 = vor.u32 %v3293_v13, %v2271_v11 }
   0xf   :  { %v2344_v12 = vor.u32 %v3311_v10, %v2343_v9  ;;  %v3325_v15 = vld [vmem:[#allocation4 + $0x164] sm:$0xf0]  ;;  %1545 = vmatpush.bf16.msra.mxu2 %v2408_v7  ;;  %v2463_v18 = vld [vmem:[#allocation4 + $0x1e0] sm:$0xf]  ;;  %v2263_v23 = vld [vmem:[#allocation4 + $0x50] sm:$0xf] }
  0x10   :  { %1558 = vmatpush.bf16.msra.mxu3 %v2472_v8  ;;  %v2400_v17 = vor.u32 %v3325_v15, %v2399_v14  ;;  %v3341_v19 = vld [vmem:[#allocation4 + $0x1e4] sm:$0xf0]  ;;  %v2335_v20 = vld [vmem:[#allocation4 + $0xe0] sm:$0xf]  ;;  %v3291_v24 = vld [vmem:[#allocation4 + $0x54] sm:$0xf0] }
  0x11   :  { %1532 = vmatpush.bf16.msra.mxu1 %v2344_v12  ;;  %v2464_v21 = vor.u32 %v3341_v19, %v2463_v18  ;;  %v3309_v22 = vld [vmem:[#allocation4 + $0xe4] sm:$0xf0]  ;;  %v2391_v26 = vld [vmem:[#allocation4 + $0x150] sm:$0xf]  ;;  %v3323_v27 = vld [vmem:[#allocation4 + $0x154] sm:$0xf0]  ;;  %v2264_v29 = vor.u32 %v3291_v24, %v2263_v23 }
  0x12   :  { %v2336_v25 = vor.u32 %v3309_v22, %v2335_v20  ;;  %v2455_v28 = vld [vmem:[#allocation4 + $0x1d0] sm:$0xf]  ;;  %1520 = vmatpush.bf16.msra.mxu0 %v2272_v16  ;;  %v3339_v30 = vld [vmem:[#allocation4 + $0x1d4] sm:$0xf0]  ;;  %v2392_v33 = vor.u32 %v3323_v27, %v2391_v26  ;;  %v2255_v35 = vld [vmem:[#allocation4 + $0x40] sm:$0xf] }
  0x13   :  { %v2327_v31 = vld [vmem:[#allocation4 + $0xd0] sm:$0xf]  ;;  %v3307_v32 = vld [vmem:[#allocation4 + $0xd4] sm:$0xf0]  ;;  %1546 = vmatpush.bf16.msra.mxu2 %v2400_v17  ;;  %v2456_v34 = vor.u32 %v3339_v30, %v2455_v28  ;;  %v3289_v36 = vld [vmem:[#allocation4 + $0x44] sm:$0xf0] }
  0x14   :  { %1559 = vmatpush.bf16.msra.mxu3 %v2464_v21  ;;  %v2383_v37 = vld [vmem:[#allocation4 + $0x140] sm:$0xf]  ;;  %v2328_v38 = vor.u32 %v3307_v32, %v2327_v31  ;;  %v3321_v39 = vld [vmem:[#allocation4 + $0x144] sm:$0xf0]  ;;  %v2256_v44 = vor.u32 %v3289_v36, %v2255_v35  ;;  %v2247_v47 = vld [vmem:[#allocation4 + $0x30] sm:$0xf] }
  0x15   :  { %1533 = vmatpush.bf16.msra.mxu1 %v2336_v25  ;;  %v2447_v40 = vld [vmem:[#allocation4 + $0x1c0] sm:$0xf]  ;;  %v3337_v41 = vld [vmem:[#allocation4 + $0x1c4] sm:$0xf0]  ;;  %v2384_v45 = vor.u32 %v3321_v39, %v2383_v37  ;;  %v3287_v48 = vld [vmem:[#allocation4 + $0x34] sm:$0xf0] }
  0x16   :  { %v2319_v42 = vld [vmem:[#allocation4 + $0xc0] sm:$0xf]  ;;  %v3305_v43 = vld [vmem:[#allocation4 + $0xc4] sm:$0xf0]  ;;  %1521 = vmatpush.bf16.msra.mxu0 %v2264_v29  ;;  %v2448_v46 = vor.u32 %v3337_v41, %v2447_v40  ;;  %v2375_v49 = vld [vmem:[#allocation4 + $0x130] sm:$0xf]  ;;  %v2248_v56 = vor.u32 %v3287_v48, %v2247_v47 }
  0x17   :  { %1547 = vmatpush.bf16.msra.mxu2 %v2392_v33  ;;  %v2320_v50 = vor.u32 %v3305_v43, %v2319_v42  ;;  %v3319_v51 = vld [vmem:[#allocation4 + $0x134] sm:$0xf0]  ;;  %v2439_v52 = vld [vmem:[#allocation4 + $0x1b0] sm:$0xf]  ;;  %v2239_v59 = vld [vmem:[#allocation4 + $0x20] sm:$0xf] }
  0x18   :  { %1560 = vmatpush.bf16.msra.mxu3 %v2456_v34  ;;  %v3335_v53 = vld [vmem:[#allocation4 + $0x1b4] sm:$0xf0]  ;;  %v2311_v54 = vld [vmem:[#allocation4 + $0xb0] sm:$0xf]  ;;  %v2376_v57 = vor.u32 %v3319_v51, %v2375_v49  ;;  %v3285_v60 = vld [vmem:[#allocation4 + $0x24] sm:$0xf0] }
  0x19   :  { %1534 = vmatpush.bf16.msra.mxu1 %v2328_v38  ;;  %v3303_v55 = vld [vmem:[#allocation4 + $0xb4] sm:$0xf0]  ;;  %v2440_v58 = vor.u32 %v3335_v53, %v2439_v52  ;;  %v2367_v61 = vld [vmem:[#allocation4 + $0x120] sm:$0xf]  ;;  %v3317_v63 = vld [vmem:[#allocation4 + $0x124] sm:$0xf0]  ;;  %v2240_v4 = vor.u32 %v3285_v60, %v2239_v59 }
  0x1a   :  { %1522 = vmatpush.bf16.msra.mxu0 %v2256_v44  ;;  %v2312_v62 = vor.u32 %v3303_v55, %v2311_v54  ;;  %v2431_v0 = vld [vmem:[#allocation4 + $0x1a0] sm:$0xf]  ;;  %v3333_v1 = vld [vmem:[#allocation4 + $0x1a4] sm:$0xf0]  ;;  %v2368_v5 = vor.u32 %v3317_v63, %v2367_v61  ;;  %v2231_v7 = vld [vmem:[#allocation4 + $0x10] sm:$0xf] }
  0x1b   :  { %1548 = vmatpush.bf16.msra.mxu2 %v2384_v45  ;;  %v2303_v2 = vld [vmem:[#allocation4 + $0xa0] sm:$0xf]  ;;  %v3301_v3 = vld [vmem:[#allocation4 + $0xa4] sm:$0xf0]  ;;  %v2432_v6 = vor.u32 %v3333_v1, %v2431_v0  ;;  %v3283_v8 = vld [vmem:[#allocation4 + $0x14] sm:$0xf0] }
  0x1c   :  { %1561 = vmatpush.bf16.msra.mxu3 %v2448_v46  ;;  %v2359_v9 = vld [vmem:[#allocation4 + $0x110] sm:$0xf]  ;;  %v2304_v10 = vor.u32 %v3301_v3, %v2303_v2  ;;  %v3315_v11 = vld [vmem:[#allocation4 + $0x114] sm:$0xf0]  ;;  %v2232_v16 = vor.u32 %v3283_v8, %v2231_v7  ;;  %v2223_v17 = vld [vmem:[#allocation4] sm:$0xf] }
  0x1d   :  { %1535 = vmatpush.bf16.msra.mxu1 %v2320_v50  ;;  %v2423_v12 = vld [vmem:[#allocation4 + $0x190] sm:$0xf]  ;;  %v3331_v13 = vld [vmem:[#allocation4 + $0x194] sm:$0xf0]  ;;  %v3281_v18 = vld [vmem:[#allocation4 + $0x4] sm:$0xf0]  ;;  %v2360_v19 = vor.u32 %v3315_v11, %v2359_v9 }
  0x1e   :  { %1523 = vmatpush.bf16.msra.mxu0 %v2248_v56  ;;  %v2295_v14 = vld [vmem:[#allocation4 + $0x90] sm:$0xf]  ;;  %v3299_v15 = vld [vmem:[#allocation4 + $0x94] sm:$0xf0]  ;;  %v2424_v20 = vor.u32 %v3331_v13, %v2423_v12  ;;  %v2351_v21 = vld [vmem:[#allocation4 + $0x100] sm:$0xf]  ;;  %v2224_v31 = vor.u32 %v3281_v18, %v2223_v17 }
  0x1f   :  { %1549 = vmatpush.bf16.msra.mxu2 %v2376_v57  ;;  %v3313_v22 = vld [vmem:[#allocation4 + $0x104] sm:$0xf0]  ;;  %v2415_v23 = vld [vmem:[#allocation4 + $0x180] sm:$0xf]  ;;  %v2296_v24 = vor.u32 %v3299_v15, %v2295_v14  ;;  %v2535_v26 = vld [vmem:[#allocation4 + $0x270] sm:$0xf] }
  0x20   :  { %1562 = vmatpush.bf16.msra.mxu3 %v2440_v58  ;;  %v3329_v25 = vld [vmem:[#allocation4 + $0x184] sm:$0xf0]  ;;  %v3359_v27 = vld [vmem:[#allocation4 + $0x274] sm:$0xf0]  ;;  %v2663_v28 = vld [vmem:[#allocation4 + $0x370] sm:$0xf]  ;;  %v2352_v35 = vor.u32 %v3313_v22, %v2351_v21 }
  0x21   :  { %1536 = vmatpush.bf16.msra.mxu1 %v2312_v62  ;;  %v3391_v29 = vld [vmem:[#allocation4 + $0x374] sm:$0xf0]  ;;  %v2727_v30 = vld [vmem:[#allocation4 + $0x3f0] sm:$0xf]  ;;  %v2287_v33 = vld [vmem:[#allocation4 + $0x80] sm:$0xf]  ;;  %v2416_v36 = vor.u32 %v3329_v25, %v2415_v23  ;;  %v2536_v39 = vor.u32 %v3359_v27, %v2535_v26 }
  0x22   :  { %1524 = vmatpush.bf16.msra.mxu0 %v2240_v4  ;;  %v3407_v32 = vld [vmem:[#allocation4 + $0x3f4] sm:$0xf0]  ;;  %v3297_v34 = vld [vmem:[#allocation4 + $0x84] sm:$0xf0]  ;;  %v2599_v37 = vld [vmem:[#allocation4 + $0x2f0] sm:$0xf]  ;;  %v2664_v40 = vor.u32 %v3391_v29, %v2663_v28 }
  0x23   :  { %1550 = vmatpush.bf16.msra.mxu2 %v2368_v5  ;;  %v3375_v38 = vld [vmem:[#allocation4 + $0x2f4] sm:$0xf0]  ;;  %v2527_v41 = vld [vmem:[#allocation4 + $0x260] sm:$0xf]  ;;  %v2728_v42 = vor.u32 %v3407_v32, %v2727_v30  ;;  %v2288_v43 = vor.u32 %v3297_v34, %v2287_v33  ;;  %v3357_v44 = vld [vmem:[#allocation4 + $0x264] sm:$0xf0] }
  0x24   :  { %1563 = vmatpush.bf16.msra.mxu3 %v2432_v6  ;;  %v2655_v45 = vld [vmem:[#allocation4 + $0x360] sm:$0xf]  ;;  %v3389_v46 = vld [vmem:[#allocation4 + $0x364] sm:$0xf0]  ;;  %v2600_v47 = vor.u32 %v3375_v38, %v2599_v37  ;;  %v2528_v52 = vor.u32 %v3357_v44, %v2527_v41  ;;  %v2519_v54 = vld [vmem:[#allocation4 + $0x250] sm:$0xf] }
  0x25   :  { %1537 = vmatpush.bf16.msra.mxu1 %v2304_v10  ;;  %v2719_v48 = vld [vmem:[#allocation4 + $0x3e0] sm:$0xf]  ;;  %v3405_v49 = vld [vmem:[#allocation4 + $0x3e4] sm:$0xf0]  ;;  %v2656_v53 = vor.u32 %v3389_v46, %v2655_v45  ;;  %v3355_v56 = vld [vmem:[#allocation4 + $0x254] sm:$0xf0] }
  0x26   :  { %1525 = vmatpush.bf16.msra.mxu0 %v2232_v16  ;;  %v2591_v50 = vld [vmem:[#allocation4 + $0x2e0] sm:$0xf]  ;;  %v3373_v51 = vld [vmem:[#allocation4 + $0x2e4] sm:$0xf0]  ;;  %v2720_v55 = vor.u32 %v3405_v49, %v2719_v48  ;;  %v2647_v57 = vld [vmem:[#allocation4 + $0x350] sm:$0xf]  ;;  %v2520_v1 = vor.u32 %v3355_v56, %v2519_v54 }
  0x27   :  { %1551 = vmatpush.bf16.msra.mxu2 %v2360_v19  ;;  %v3387_v58 = vld [vmem:[#allocation4 + $0x354] sm:$0xf0]  ;;  %v2592_v59 = vor.u32 %v3373_v51, %v2591_v50  ;;  %v2711_v60 = vld [vmem:[#allocation4 + $0x3d0] sm:$0xf]  ;;  %v2511_v3 = vld [vmem:[#allocation4 + $0x240] sm:$0xf] }
  0x28   :  { %1564 = vmatpush.bf16.msra.mxu3 %v2424_v20  ;;  %v3403_v61 = vld [vmem:[#allocation4 + $0x3d4] sm:$0xf0]  ;;  %v2583_v62 = vld [vmem:[#allocation4 + $0x2d0] sm:$0xf]  ;;  %v2648_v2 = vor.u32 %v3387_v58, %v2647_v57  ;;  %v3353_v4 = vld [vmem:[#allocation4 + $0x244] sm:$0xf0] }
  0x29   :  { %1538 = vmatpush.bf16.msra.mxu1 %v2296_v24  ;;  %v3371_v63 = vld [vmem:[#allocation4 + $0x2d4] sm:$0xf0]  ;;  %v63_v6 = vld [vmem:[#allocation2] sm:$0xff]  ;;  %v2712_v7 = vor.u32 %v3403_v61, %v2711_v60  ;;  %v2639_v8 = vld [vmem:[#allocation4 + $0x340] sm:$0xf]  ;;  %v2512_v19 = vor.u32 %v3353_v4, %v2511_v3  ;;  %vm1515_vm0 = vcmask 785408  }
  0x2a   :  { %1526 = vmatpush.bf16.msra.mxu0 %v2224_v31  ;;  %v65_v0 = vld [vmem:[#allocation2 + $0x10] sm:$0xff]  ;;  %v3385_v9 = vld [vmem:[#allocation4 + $0x344] sm:$0xf0]  ;;  %v3667_v10 = vpack.c.bf16 %v63_v6, %v63_v6  ;;  %v66_v11 = vld [vmem:[#allocation2 + $0x18] sm:$0xff]  ;;  %v2584_v12 = vor.u32 %v3371_v63, %v2583_v62  ;;  %vm2192_vm1 = vcmask 523264   ;;  %vm2213_vm2 = vcmask 15360  }
  0x2b   :  { %1552 = vmatpush.bf16.msra.mxu2 %v2352_v35  ;;  %v3665_v5 = vpack.c.bf16 %v65_v0, %v65_v0  ;;  %v2703_v13 = vld [vmem:[#allocation4 + $0x3c0] sm:$0xf]  ;;  %v3401_v14 = vld [vmem:[#allocation4 + $0x3c4] sm:$0xf0]  ;;  %v3670_v15 = vpack.c.bf16 %v66_v11, %v66_v11  ;;  %v64_v18 = vld [vmem:[#allocation2 + $0x8] sm:$0xff]  ;;  %v2640_v20 = vor.u32 %v3385_v9, %v2639_v8 }
  0x2c   :  { %1565 = vmatpush.bf16.msra.mxu3 %v2416_v36  ;;  %v2575_v16 = vld [vmem:[#allocation4 + $0x2c0] sm:$0xf]  ;;  %v3369_v17 = vld [vmem:[#allocation4 + $0x2c4] sm:$0xf0]  ;;  %v2503_v21 = vld [vmem:[#allocation4 + $0x230] sm:$0xf]  ;;  %v3673_v22 = vpack.c.bf16 %v64_v18, %v64_v18  ;;  %v2704_v23 = vor.u32 %v3401_v14, %v2703_v13 }
  0x2d   :  { %1539 = vmatpush.bf16.msra.mxu1 %v2288_v43  ;;  %1527 = vmatmul.bf16.vlgmr.msra.gmra.mxu0 %v3667_v10  ;;  %v3351_v24 = vld [vmem:[#allocation4 + $0x234] sm:$0xf0]  ;;  %v2631_v25 = vld [vmem:[#allocation4 + $0x330] sm:$0xf]  ;;  %v2576_v27 = vor.u32 %v3369_v17, %v2575_v16  ;;  %v2495_v34 = vld [vmem:[#allocation4 + $0x220] sm:$0xf] }
  0x2e   :  { %1571 = vmatpush.bf16.msrb.mxu0 %v2536_v39  ;;  %1553 = vmatmul.bf16.vlgmr.msra.gmra.mxu2 %v3665_v5  ;;  %v3383_v26 = vld [vmem:[#allocation4 + $0x334] sm:$0xf0]  ;;  %v2695_v28 = vld [vmem:[#allocation4 + $0x3b0] sm:$0xf]  ;;  %v2504_v32 = vor.u32 %v3351_v24, %v2503_v21  ;;  %v3349_v36 = vld [vmem:[#allocation4 + $0x224] sm:$0xf0] }
  0x2f   :  { %1597 = vmatpush.bf16.msrb.mxu2 %v2664_v40  ;;  %v3399_v29 = vld [vmem:[#allocation4 + $0x3b4] sm:$0xf0]  ;;  %1566 = vmatmul.bf16.vlgmr.msra.gmra.mxu3 %v3670_v15  ;;  %v2567_v30 = vld [vmem:[#allocation4 + $0x2b0] sm:$0xf]  ;;  %v2632_v33 = vor.u32 %v3383_v26, %v2631_v25  ;;  %v2623_v37 = vld [vmem:[#allocation4 + $0x320] sm:$0xf]  ;;  %v2496_v44 = vor.u32 %v3349_v36, %v2495_v34 }
  0x30   :  { %1610 = vmatpush.bf16.msrb.mxu3 %v2728_v42  ;;  %v3367_v31 = vld [vmem:[#allocation4 + $0x2b4] sm:$0xf0]  ;;  %1540 = vmatmul.bf16.vlgmr.msra.gmra.mxu1 %v3673_v22  ;;  %v2696_v35 = vor.u32 %v3399_v29, %v2695_v28  ;;  %v3381_v38 = vld [vmem:[#allocation4 + $0x324] sm:$0xf0]  ;;  %v2687_v40 = vld [vmem:[#allocation4 + $0x3a0] sm:$0xf] }
  0x31   :  { %1584 = vmatpush.bf16.msrb.mxu1 %v2600_v47  ;;  %v2568_v39 = vor.u32 %v3367_v31, %v2567_v30  ;;  %v3397_v41 = vld [vmem:[#allocation4 + $0x3a4] sm:$0xf0]  ;;  %v2559_v42 = vld [vmem:[#allocation4 + $0x2a0] sm:$0xf]  ;;  %v2624_v45 = vor.u32 %v3381_v38, %v2623_v37  ;;  %v2487_v46 = vld [vmem:[#allocation4 + $0x210] sm:$0xf] }
  0x32   :  { %1572 = vmatpush.bf16.msrb.mxu0 %v2528_v52  ;;  %v3365_v43 = vld [vmem:[#allocation4 + $0x2a4] sm:$0xf0]  ;;  %v2688_v47 = vor.u32 %v3397_v41, %v2687_v40  ;;  %v3347_v48 = vld [vmem:[#allocation4 + $0x214] sm:$0xf0]  ;;  %v2615_v49 = vld [vmem:[#allocation4 + $0x310] sm:$0xf] }
  0x33   :  { %1598 = vmatpush.bf16.msrb.mxu2 %v2656_v53  ;;  %v3379_v50 = vld [vmem:[#allocation4 + $0x314] sm:$0xf0]  ;;  %v2560_v51 = vor.u32 %v3365_v43, %v2559_v42  ;;  %v2679_v52 = vld [vmem:[#allocation4 + $0x390] sm:$0xf]  ;;  %v2479_v56 = vld [vmem:[#allocation4 + $0x200] sm:$0xf]  ;;  %v2488_v57 = vor.u32 %v3347_v48, %v2487_v46 }
  0x34   :  { %1611 = vmatpush.bf16.msrb.mxu3 %v2720_v55  ;;  %v3395_v53 = vld [vmem:[#allocation4 + $0x394] sm:$0xf0]  ;;  %v2551_v54 = vld [vmem:[#allocation4 + $0x290] sm:$0xf]  ;;  %v2616_v58 = vor.u32 %v3379_v50, %v2615_v49  ;;  %v2607_v60 = vld [vmem:[#allocation4 + $0x300] sm:$0xf] }
  0x35   :  { %1585 = vmatpush.bf16.msrb.mxu1 %v2592_v59  ;;  %v3363_v55 = vld [vmem:[#allocation4 + $0x294] sm:$0xf0]  ;;  %v3345_v59 = vld [vmem:[#allocation4 + $0x204] sm:$0xf0]  ;;  %v2680_v62 = vor.u32 %v3395_v53, %v2679_v52  ;;  %v2671_v63 = vld [vmem:[#allocation4 + $0x380] sm:$0xf] }
  0x36   :  { %1573 = vmatpush.bf16.msrb.mxu0 %v2520_v1  ;;  %v3377_v61 = vld [vmem:[#allocation4 + $0x304] sm:$0xf0]  ;;  %v2791_v1 = vld [vmem:[#allocation4 + $0x470] sm:$0xf]  ;;  %v3423_v3 = vld [vmem:[#allocation4 + $0x474] sm:$0xf0]  ;;  %v2480_v11 = vor.u32 %v3345_v59, %v2479_v56 }
  0x37   :  { %1599 = vmatpush.bf16.msrb.mxu2 %v2648_v2  ;;  %v3393_v0 = vld [vmem:[#allocation4 + $0x384] sm:$0xf0]  ;;  %v2552_v2 = vor.u32 %v3363_v55, %v2551_v54  ;;  %v2919_v4 = vld [vmem:[#allocation4 + $0x570] sm:$0xf]  ;;  %v3455_v6 = vld [vmem:[#allocation4 + $0x574] sm:$0xf0]  ;;  %v2792_v18 = vor.u32 %v3423_v3, %v2791_v1 }
  0x38   :  { %1612 = vmatpush.bf16.msrb.mxu3 %v2712_v7  ;;  %v2983_v7 = vld [vmem:[#allocation4 + $0x5f0] sm:$0xf]  ;;  %v3471_v8 = vld [vmem:[#allocation4 + $0x5f4] sm:$0xf0]  ;;  %v2543_v9 = vld [vmem:[#allocation4 + $0x280] sm:$0xf]  ;;  %v2672_v17 = vor.u32 %v3393_v0, %v2671_v63 }
  0x39   :  { %1586 = vmatpush.bf16.msrb.mxu1 %v2584_v12  ;;  %v2608_v12 = vor.u32 %v3377_v61, %v2607_v60  ;;  %v3361_v13 = vld [vmem:[#allocation4 + $0x284] sm:$0xf0]  ;;  %v2855_v14 = vld [vmem:[#allocation4 + $0x4f0] sm:$0xf]  ;;  %v69_v16 = vld [vmem:[#allocation2 + $0x30] sm:$0xff]  ;;  %v2984_v24 = vor.u32 %v3471_v8, %v2983_v7 }
  0x3a   :  { %1574 = vmatpush.bf16.msrb.mxu0 %v2512_v19  ;;  %v3439_v19 = vld [vmem:[#allocation4 + $0x4f4] sm:$0xf0]  ;;  %v67_v21 = vld [vmem:[#allocation2 + $0x20] sm:$0xff]  ;;  %v2911_v26 = vld [vmem:[#allocation4 + $0x560] sm:$0xf]  ;;  %v2544_v28 = vor.u32 %v3361_v13, %v2543_v9 }
  0x3b   :  { %1600 = vmatpush.bf16.msrb.mxu2 %v2640_v20  ;;  %v2783_v20 = vld [vmem:[#allocation4 + $0x460] sm:$0xf]  ;;  %v3421_v25 = vld [vmem:[#allocation4 + $0x464] sm:$0xf0]  ;;  %v3679_v34 = vpack.c.bf16 %v67_v21, %v67_v21  ;;  %v2775_v42 = vld [vmem:[#allocation4 + $0x450] sm:$0xf] }
  0x3c   :  { %1613 = vmatpush.bf16.msrb.mxu3 %v2704_v23  ;;  %v2920_v23 = vor.u32 %v3455_v6, %v2919_v4  ;;  %v3453_v29 = vld [vmem:[#allocation4 + $0x564] sm:$0xf0]  ;;  %v2975_v30 = vld [vmem:[#allocation4 + $0x5e0] sm:$0xf]  ;;  %v2784_v36 = vor.u32 %v3421_v25, %v2783_v20  ;;  %v3419_v43 = vld [vmem:[#allocation4 + $0x454] sm:$0xf0] }
  0x3d   :  { %1587 = vmatpush.bf16.msrb.mxu1 %v2576_v27  ;;  %v70_v27 = vld [vmem:[#allocation2 + $0x38] sm:$0xff]  ;;  %v3469_v31 = vld [vmem:[#allocation4 + $0x5e4] sm:$0xf0]  ;;  %v2912_v40 = vor.u32 %v3453_v29, %v2911_v26  ;;  %v2967_v46 = vld [vmem:[#allocation4 + $0x5d0] sm:$0xf]  ;;  %v2776_v50 = vor.u32 %v3419_v43, %v2775_v42 }
  0x3e   :  { %1575 = vmatpush.bf16.msrb.mxu0 %v2504_v32  ;;  %v3677_v32 = vpack.c.bf16 %v69_v16, %v69_v16  ;;  %v2847_v37 = vld [vmem:[#allocation4 + $0x4e0] sm:$0xf]  ;;  %v3437_v38 = vld [vmem:[#allocation4 + $0x4e4] sm:$0xf0]  ;;  %v2976_v41 = vor.u32 %v3469_v31, %v2975_v30  ;;  %v3435_v52 = vld [vmem:[#allocation4 + $0x4d4] sm:$0xf0] }
  0x3f   :  { %1601 = vmatpush.bf16.msrb.mxu2 %v2632_v33  ;;  %v2856_v33 = vor.u32 %v3439_v19, %v2855_v14  ;;  %v2848_v49 = vor.u32 %v3437_v38, %v2847_v37  ;;  %v2767_v55 = vld [vmem:[#allocation4 + $0x440] sm:$0xf]  ;;  %v3417_v56 = vld [vmem:[#allocation4 + $0x444] sm:$0xf0]  ;;  %v2759_v3 = vld [vmem:[#allocation4 + $0x430] sm:$0xf] }
  0x40   :  { %1614 = vmatpush.bf16.msrb.mxu3 %v2696_v35  ;;  %v68_v35 = vld [vmem:[#allocation2 + $0x28] sm:$0xff]  ;;  %v2959_v59 = vld [vmem:[#allocation4 + $0x5c0] sm:$0xf]  ;;  %v3465_v60 = vld [vmem:[#allocation4 + $0x5c4] sm:$0xf0] }
  0x41   :  { %1588 = vmatpush.bf16.msrb.mxu1 %v2568_v39  ;;  %v3681_v39 = vpack.c.bf16 %v70_v27, %v70_v27  ;;  %v3684_v48 = vpack.c.bf16 %v68_v35, %v68_v35  ;;  %v2831_v63 = vld [vmem:[#allocation4 + $0x4c0] sm:$0xf]  ;;  %v3433_v0 = vld [vmem:[#allocation4 + $0x4c4] sm:$0xf0]  ;;  %v3415_v4 = vld [vmem:[#allocation4 + $0x434] sm:$0xf0] }
  0x42   :  { %1576 = vmatpush.bf16.msrb.mxu0 %v2496_v44  ;;  %v2903_v44 = vld [vmem:[#allocation4 + $0x550] sm:$0xf]  ;;  %v3447_v7 = vld [vmem:[#allocation4 + $0x534] sm:$0xf0]  ;;  %v3413_v19 = vld [vmem:[#allocation4 + $0x424] sm:$0xf0] }
  0x43   :  { %1602 = vmatpush.bf16.msrb.mxu2 %v2624_v45  ;;  %v3451_v45 = vld [vmem:[#allocation4 + $0x554] sm:$0xf0]  ;;  %v2887_v6 = vld [vmem:[#allocation4 + $0x530] sm:$0xf]  ;;  %v2879_v20 = vld [vmem:[#allocation4 + $0x520] sm:$0xf] }
  0x44   :  { %1615 = vmatpush.bf16.msrb.mxu3 %v2688_v47  ;;  %v3467_v47 = vld [vmem:[#allocation4 + $0x5d4] sm:$0xf0]  ;;  %v2904_v53 = vor.u32 %v3451_v45, %v2903_v44  ;;  %v2951_v8 = vld [vmem:[#allocation4 + $0x5b0] sm:$0xf]  ;;  %v2888_v16 = vor.u32 %v3447_v7, %v2887_v6  ;;  %v3445_v21 = vld [vmem:[#allocation4 + $0x524] sm:$0xf0] }
  0x45   :  { %1589 = vmatpush.bf16.msrb.mxu1 %v2560_v51  ;;  %v2839_v51 = vld [vmem:[#allocation4 + $0x4d0] sm:$0xf]  ;;  %v2968_v54 = vor.u32 %v3467_v47, %v2967_v46  ;;  %v3463_v9 = vld [vmem:[#allocation4 + $0x5b4] sm:$0xf0]  ;;  %v2815_v27 = vld [vmem:[#allocation4 + $0x4a0] sm:$0xf]  ;;  %v2880_v29 = vor.u32 %v3445_v21, %v2879_v20 }
  0x46   :  { %1577 = vmatpush.bf16.msrb.mxu0 %v2488_v57  ;;  %v2895_v57 = vld [vmem:[#allocation4 + $0x540] sm:$0xf]  ;;  %v2840_v61 = vor.u32 %v3435_v52, %v2839_v51  ;;  %v2823_v13 = vld [vmem:[#allocation4 + $0x4b0] sm:$0xf]  ;;  %v3431_v14 = vld [vmem:[#allocation4 + $0x4b4] sm:$0xf0] }
  0x47   :  { %1603 = vmatpush.bf16.msrb.mxu2 %v2616_v58  ;;  %v3449_v58 = vld [vmem:[#allocation4 + $0x544] sm:$0xf0]  ;;  %v2824_v25 = vor.u32 %v3431_v14, %v2823_v13  ;;  %v2743_v31 = vld [vmem:[#allocation4 + $0x410] sm:$0xf]  ;;  %v3459_v38 = vld [vmem:[#allocation4 + $0x594] sm:$0xf0] }
  0x48   :  { %1616 = vmatpush.bf16.msrb.mxu3 %v2680_v62  ;;  %v2768_v62 = vor.u32 %v3417_v56, %v2767_v55  ;;  %v2896_v1 = vor.u32 %v3449_v58, %v2895_v57  ;;  %v2871_v35 = vld [vmem:[#allocation4 + $0x510] sm:$0xf]  ;;  %v3427_v43 = vld [vmem:[#allocation4 + $0x494] sm:$0xf0]  ;;  %v2735_v44 = vld [vmem:[#allocation4 + $0x400] sm:$0xf] }
  0x49   :  { %1590 = vmatpush.bf16.msrb.mxu1 %v2552_v2  ;;  %v2960_v2 = vor.u32 %v3465_v60, %v2959_v59  ;;  %v2935_v37 = vld [vmem:[#allocation4 + $0x590] sm:$0xf]  ;;  %v3409_v45 = vld [vmem:[#allocation4 + $0x404] sm:$0xf0]  ;;  %v2927_v51 = vld [vmem:[#allocation4 + $0x580] sm:$0xf] }
  0x4a   :  { %1578 = vmatpush.bf16.msrb.mxu0 %v2480_v11  ;;  %v2832_v11 = vor.u32 %v3433_v0, %v2831_v63  ;;  %v2936_v47 = vor.u32 %v3459_v38, %v2935_v37  ;;  %v3457_v52 = vld [vmem:[#allocation4 + $0x584] sm:$0xf0]  ;;  %v3159_v56 = vld [vmem:[#allocation4 + $0x750] sm:$0xf]  ;;  %v3515_v57 = vld [vmem:[#allocation4 + $0x754] sm:$0xf0]  ;;  %v2736_v59 = vor.u32 %v3409_v45, %v2735_v44 }
  0x4b   :  { %1604 = vmatpush.bf16.msrb.mxu2 %v2608_v12  ;;  %v2760_v12 = vor.u32 %v3415_v4, %v2759_v3  ;;  %v3294_v58 = vld [vmem:[#allocation4 + $0x74] sm:$0xf]  ;;  %v2281_v60 = vld [vmem:[#allocation4 + $0x78] sm:$0xf0]  ;;  %v2928_v0 = vor.u32 %v3457_v52, %v2927_v51  ;;  %v3111_v3 = vld [vmem:[#allocation4 + $0x6f0] sm:$0xf]  ;;  %v3160_v6 = vor.u32 %v3515_v57, %v3159_v56 }
  0x4c   :  { %1617 = vmatpush.bf16.msrb.mxu3 %v2672_v17  ;;  %v2952_v17 = vor.u32 %v3463_v9, %v2951_v8  ;;  %v3503_v7 = vld [vmem:[#allocation4 + $0x6f4] sm:$0xf0]  ;;  %v72_v8 = vld [vmem:[#allocation2 + $0x48] sm:$0xff]  ;;  %v74_v9 = vld [vmem:[#allocation2 + $0x58] sm:$0xff] }
  0x4d   :  { %1591 = vmatpush.bf16.msrb.mxu1 %v2544_v28  ;;  %1579 = vmatmul.bf16.vlgmr.msrb.gmra.mxu0 %v3679_v34  ;;  %v3429_v28 = vld [vmem:[#allocation4 + $0x4a4] sm:$0xf0]  ;;  %v3039_v13 = vld [vmem:[#allocation4 + $0x660] sm:$0xf]  ;;  %v3292_v20 = vld [vmem:[#allocation4 + $0x64] sm:$0xf] }
  0x4e   :  { %1623 = vmatpush.bf16.msra.mxu0 %v2792_v18  ;;  %1605 = vmatmul.bf16.vlgmr.msrb.gmra.mxu2 %v3677_v32  ;;  %v2751_v18 = vld [vmem:[#allocation4 + $0x420] sm:$0xf]  ;;  %v3485_v14 = vld [vmem:[#allocation4 + $0x664] sm:$0xf0]  ;;  %v2273_v21 = vld [vmem:[#allocation4 + $0x68] sm:$0xf0] }
  0x4f   :  { %1649 = vmatpush.bf16.msra.mxu2 %v2920_v23  ;;  %1618 = vmatmul.bf16.vlgmr.msrb.gmra.mxu3 %v3681_v39  ;;  %v2943_v23 = vld [vmem:[#allocation4 + $0x5a0] sm:$0xf]  ;;  %v2752_v26 = vor.u32 %v3413_v19, %v2751_v18  ;;  %v3513_v19 = vld [vmem:[#allocation4 + $0x744] sm:$0xf0]  ;;  %v3290_v37 = vld [vmem:[#allocation4 + $0x54] sm:$0xf] }
  0x50   :  { %1662 = vmatpush.bf16.msra.mxu3 %v2984_v24  ;;  %1592 = vmatmul.bf16.vlgmr.msrb.gmra.mxu1 %v3684_v48  ;;  %v3461_v24 = vld [vmem:[#allocation4 + $0x5a4] sm:$0xf0]  ;;  %v2265_v38 = vld [vmem:[#allocation4 + $0x58] sm:$0xf0]  ;;  %v3023_v44 = vld [vmem:[#allocation4 + $0x640] sm:$0xf] }
  0x51   :  { %1636 = vmatpush.bf16.msra.mxu1 %v2856_v33  ;;  %v2944_v30 = vor.u32 %v3461_v24, %v2943_v23  ;;  %v3411_v33 = vld [vmem:[#allocation4 + $0x414] sm:$0xf0]  ;;  %v3112_v23 = vor.u32 %v3503_v7, %v3111_v3  ;;  %v3693_v24 = vpack.c.bf16 %v74_v9, %v74_v9  ;;  %v3288_v51 = vld [vmem:[#allocation4 + $0x44] sm:$0xf]  ;;  %v2257_v52 = vld [vmem:[#allocation4 + $0x48] sm:$0xf0] }
  0x52   :  { %1624 = vmatpush.bf16.msra.mxu0 %v2784_v36  ;;  %v3443_v36 = vld [vmem:[#allocation4 + $0x514] sm:$0xf0]  ;;  %v2744_v42 = vor.u32 %v3411_v33, %v2743_v31  ;;  %v3031_v31 = vld [vmem:[#allocation4 + $0x650] sm:$0xf]  ;;  %v3497_v56 = vld [vmem:[#allocation4 + $0x6c4] sm:$0xf0] }
  0x53   :  { %1650 = vmatpush.bf16.msra.mxu2 %v2912_v40  ;;  %v2816_v40 = vor.u32 %v3429_v28, %v2815_v27  ;;  %v2872_v46 = vor.u32 %v3443_v36, %v2871_v35  ;;  %v3103_v27 = vld [vmem:[#allocation4 + $0x6e0] sm:$0xf]  ;;  %v3501_v28 = vld [vmem:[#allocation4 + $0x6e4] sm:$0xf0]  ;;  %v3483_v33 = vld [vmem:[#allocation4 + $0x654] sm:$0xf0] }
  0x54   :  { %1663 = vmatpush.bf16.msra.mxu3 %v2976_v41  ;;  %v2807_v41 = vld [vmem:[#allocation4 + $0x490] sm:$0xf]  ;;  %v3511_v36 = vld [vmem:[#allocation4 + $0x734] sm:$0xf0]  ;;  %v3477_v9 = vld [vmem:[#allocation4 + $0x624] sm:$0xf0] }
  0x55   :  { %1637 = vmatpush.bf16.msra.mxu1 %v2848_v49  ;;  %v2863_v49 = vld [vmem:[#allocation4 + $0x500] sm:$0xf]  ;;  %v2808_v55 = vor.u32 %v3427_v43, %v2807_v41  ;;  %v3143_v35 = vld [vmem:[#allocation4 + $0x730] sm:$0xf]  ;;  %v3032_v41 = vor.u32 %v3483_v33, %v3031_v31  ;;  %v3499_v43 = vld [vmem:[#allocation4 + $0x6d4] sm:$0xf0] }
  0x56   :  { %1625 = vmatpush.bf16.msra.mxu0 %v2776_v50  ;;  %v3441_v50 = vld [vmem:[#allocation4 + $0x504] sm:$0xf0]  ;;  %v3144_v45 = vor.u32 %v3511_v36, %v3143_v35  ;;  %v3079_v3 = vld [vmem:[#allocation4 + $0x6b0] sm:$0xf]  ;;  %v77_v31 = vld [vmem:[#allocation2 + $0x70] sm:$0xff] }
  0x57   :  { %1651 = vmatpush.bf16.msra.mxu2 %v2904_v53  ;;  %v3047_v53 = vld [vmem:[#allocation4 + $0x670] sm:$0xf]  ;;  %v2864_v63 = vor.u32 %v3441_v50, %v2863_v49  ;;  %v3135_v49 = vld [vmem:[#allocation4 + $0x720] sm:$0xf]  ;;  %v3509_v50 = vld [vmem:[#allocation4 + $0x724] sm:$0xf0] }
  0x58   :  { %1664 = vmatpush.bf16.msra.mxu3 %v2968_v54  ;;  %v3487_v54 = vld [vmem:[#allocation4 + $0x674] sm:$0xf0]  ;;  %v3136_v57 = vor.u32 %v3509_v50, %v3135_v49  ;;  %v3282_v35 = vld [vmem:[#allocation4 + $0x14] sm:$0xf]  ;;  %v2233_v36 = vld [vmem:[#allocation4 + $0x18] sm:$0xf0] }
  0x59   :  { %1638 = vmatpush.bf16.msra.mxu1 %v2840_v61  ;;  %v2799_v61 = vld [vmem:[#allocation4 + $0x480] sm:$0xf]  ;;  %v3048_v4 = vor.u32 %v3487_v54, %v3047_v53  ;;  %v3280_v49 = vld [vmem:[#allocation4 + $0x4] sm:$0xf]  ;;  %v2225_v50 = vld [vmem:[#allocation4 + $0x8] sm:$0xf0] }
  0x5a   :  { %1626 = vmatpush.bf16.msra.mxu0 %v2768_v62  ;;  %v3425_v62 = vld [vmem:[#allocation4 + $0x484] sm:$0xf0] }
  0x5b   :  { %1652 = vmatpush.bf16.msra.mxu2 %v2896_v1  ;;  %v71_v1 = vld [vmem:[#allocation2 + $0x40] sm:$0xff] }
  0x5c   :  { %1665 = vmatpush.bf16.msra.mxu3 %v2960_v2  ;;  %v73_v2 = vld [vmem:[#allocation2 + $0x50] sm:$0xff] }
  0x5d   :  { %1639 = vmatpush.bf16.msra.mxu1 %v2832_v11  ;;  %v2284_v11 = vor.u32 %v3294_v58, %v2281_v60  ;;  %v3691_v18 = vpack.c.bf16 %v73_v2, %v73_v2  ;;  %v2260_v58 = vor.u32 %v3288_v51, %v2257_v52  ;;  %v3479_v60 = vld [vmem:[#allocation4 + $0x634] sm:$0xf0]  ;;  %v3306_v52 = vld [vmem:[#allocation4 + $0xd4] sm:$0xf] }
  0x5e   :  { %1627 = vmatpush.bf16.msra.mxu0 %v2760_v12  ;;  %v2800_v12 = vor.u32 %v3425_v62, %v2799_v61  ;;  %v3127_v61 = vld [vmem:[#allocation4 + $0x710] sm:$0xf]  ;;  %v3507_v62 = vld [vmem:[#allocation4 + $0x714] sm:$0xf0] }
  0x5f   :  { %1653 = vmatpush.bf16.msra.mxu2 %v2888_v16  ;;  %v3151_v16 = vld [vmem:[#allocation4 + $0x740] sm:$0xf] }
  0x60   :  { %1666 = vmatpush.bf16.msra.mxu3 %v2952_v17  ;;  %v3689_v17 = vpack.c.bf16 %v71_v1, %v71_v1 }
  0x61   :  { %1640 = vmatpush.bf16.msra.mxu1 %v2824_v25  ;;  %v3695_v25 = vpack.c.bf16 %v72_v8, %v72_v8  ;;  %v3007_v8 = vld [vmem:[#allocation4 + $0x620] sm:$0xf] }
  0x62   :  { %1628 = vmatpush.bf16.msra.mxu0 %v2752_v26  ;;  %v3040_v26 = vor.u32 %v3485_v14, %v3039_v13  ;;  %v3284_v13 = vld [vmem:[#allocation4 + $0x24] sm:$0xf]  ;;  %v2241_v14 = vld [vmem:[#allocation4 + $0x28] sm:$0xf0] }
  0x63   :  { %1654 = vmatpush.bf16.msra.mxu2 %v2880_v29  ;;  %v3152_v29 = vor.u32 %v3513_v19, %v3151_v16  ;;  %v3310_v19 = vld [vmem:[#allocation4 + $0xf4] sm:$0xf] }
  0x64   :  { %1667 = vmatpush.bf16.msra.mxu3 %v2944_v30  ;;  %v2276_v30 = vor.u32 %v3292_v20, %v2273_v21  ;;  %v2345_v20 = vld [vmem:[#allocation4 + $0xf8] sm:$0xf0]  ;;  %v3008_v21 = vor.u32 %v3477_v9, %v3007_v8 }
  0x65   :  { %1641 = vmatpush.bf16.msra.mxu1 %v2816_v40  ;;  %v3104_v40 = vor.u32 %v3501_v28, %v3103_v27  ;;  %v2244_v28 = vor.u32 %v3284_v13, %v2241_v14  ;;  %v2348_v33 = vor.u32 %v3310_v19, %v2345_v20  ;;  %v2321_v13 = vld [vmem:[#allocation4 + $0xc8] sm:$0xf0] }
  0x66   :  { %1629 = vmatpush.bf16.msra.mxu0 %v2744_v42  ;;  %v3095_v42 = vld [vmem:[#allocation4 + $0x6d0] sm:$0xf]  ;;  %v2529_v19 = vld [vmem:[#allocation4 + $0x268] sm:$0xf0] }
  0x67   :  { %1655 = vmatpush.bf16.msra.mxu2 %v2872_v46  ;;  %v2268_v46 = vor.u32 %v3290_v37, %v2265_v38  ;;  %v3096_v53 = vor.u32 %v3499_v43, %v3095_v42  ;;  %v3308_v38 = vld [vmem:[#allocation4 + $0xe4] sm:$0xf]  ;;  %v3491_v43 = vld [vmem:[#allocation4 + $0x694] sm:$0xf0] }
  0x68   :  { %1668 = vmatpush.bf16.msra.mxu3 %v2936_v47  ;;  %v3481_v47 = vld [vmem:[#allocation4 + $0x644] sm:$0xf0] }
  0x69   :  { %1642 = vmatpush.bf16.msra.mxu1 %v2808_v55  ;;  %v3024_v54 = vor.u32 %v3481_v47, %v3023_v44  ;;  %v3087_v55 = vld [vmem:[#allocation4 + $0x6c0] sm:$0xf]  ;;  %v2236_v47 = vor.u32 %v3282_v35, %v2233_v36  ;;  %v3354_v36 = vld [vmem:[#allocation4 + $0x254] sm:$0xf] }
  0x6a   :  { %1630 = vmatpush.bf16.msra.mxu0 %v2736_v59  ;;  %v3015_v59 = vld [vmem:[#allocation4 + $0x630] sm:$0xf]  ;;  %v3088_v1 = vor.u32 %v3497_v56, %v3087_v55  ;;  %v2991_v44 = vld [vmem:[#allocation4 + $0x600] sm:$0xf]  ;;  %v2329_v56 = vld [vmem:[#allocation4 + $0xd8] sm:$0xf0] }
  0x6b   :  { %1656 = vmatpush.bf16.msra.mxu2 %v2864_v63  ;;  %v3286_v63 = vld [vmem:[#allocation4 + $0x34] sm:$0xf]  ;;  %v3016_v2 = vor.u32 %v3479_v60, %v3015_v59  ;;  %v3055_v60 = vld [vmem:[#allocation4 + $0x680] sm:$0xf] }
  0x6c   :  { %1669 = vmatpush.bf16.msra.mxu3 %v2928_v0  ;;  %v2249_v0 = vld [vmem:[#allocation4 + $0x38] sm:$0xf0] }
  0x6d   :  { %1643 = vmatpush.bf16.msra.mxu1 %v2800_v12  ;;  %1631 = vmatmul.bf16.vlgmr.msra.gmra.mxu0 %v3689_v17  ;;  %v2252_v7 = vor.u32 %v3286_v63, %v2249_v0  ;;  %v3505_v12 = vld [vmem:[#allocation4 + $0x704] sm:$0xf0]  ;;  %v2228_v63 = vor.u32 %v3280_v49, %v2225_v50  ;;  %v2305_v49 = vld [vmem:[#allocation4 + $0xa8] sm:$0xf0] }
  0x6e   :  { %1675 = vmatpush.bf16.msrb.mxu0 %v3048_v4  ;;  %1657 = vmatmul.bf16.vlgmr.msra.gmra.mxu2 %v3691_v18  ;;  %v3495_v4 = vld [vmem:[#allocation4 + $0x6b4] sm:$0xf0] }
  0x6f   :  { %1703 = vmatpush.bf16.msrb.mxu2 %v3160_v6  ;;  %1670 = vmatmul.bf16.vlgmr.msra.gmra.mxu3 %v3693_v24  ;;  %v3128_v6 = vor.u32 %v3507_v62, %v3127_v61  ;;  %v3080_v16 = vor.u32 %v3495_v4, %v3079_v3  ;;  %v3489_v61 = vld [vmem:[#allocation4 + $0x684] sm:$0xf0]  ;;  %v2332_v3 = vor.u32 %v3306_v52, %v2329_v56  ;;  %v2513_v52 = vld [vmem:[#allocation4 + $0x248] sm:$0xf0]  ;;  %v3318_v56 = vld [vmem:[#allocation4 + $0x134] sm:$0xf] }
  0x70   :  { %1714 = vmatpush.bf16.msrb.mxu3 %v2284_v11  ;;  %1644 = vmatmul.bf16.vlgmr.msra.gmra.mxu1 %v3695_v25  ;;  %v3119_v11 = vld [vmem:[#allocation4 + $0x700] sm:$0xf]  ;;  %v75_v62 = vld [vmem:[#allocation2 + $0x60] sm:$0xff]  ;;  %v3056_v8 = vor.u32 %v3489_v61, %v3055_v60  ;;  %v2297_v60 = vld [vmem:[#allocation4 + $0x98] sm:$0xf0] }
  0x71   :  { %1688 = vmatpush.bf16.msrb.mxu1 %v3112_v23  ;;  %v3071_v23 = vld [vmem:[#allocation4 + $0x6a0] sm:$0xf]  ;;  %v3120_v27 = vor.u32 %v3505_v12, %v3119_v11  ;;  %v3705_v9 = vpack.c.bf16 %v75_v62, %v75_v62  ;;  %v76_v11 = vld [vmem:[#allocation2 + $0x68] sm:$0xff]  ;;  %v3304_v12 = vld [vmem:[#allocation4 + $0xc4] sm:$0xf] }
  0x72   :  { %1676 = vmatpush.bf16.msrb.mxu0 %v3040_v26  ;;  %v3493_v26 = vld [vmem:[#allocation4 + $0x6a4] sm:$0xf0]  ;;  %v3350_v62 = vld [vmem:[#allocation4 + $0x234] sm:$0xf] }
  0x73   :  { %1704 = vmatpush.bf16.msrb.mxu2 %v3152_v29  ;;  %v2999_v29 = vld [vmem:[#allocation4 + $0x610] sm:$0xf]  ;;  %v3072_v37 = vor.u32 %v3493_v26, %v3071_v23  ;;  %v2465_v23 = vld [vmem:[#allocation4 + $0x1e8] sm:$0xf0]  ;;  %v3707_v26 = vpack.c.bf16 %v76_v11, %v76_v11 }
  0x74   :  { %1715 = vmatpush.bf16.msrb.mxu3 %v2276_v30  ;;  %v3475_v30 = vld [vmem:[#allocation4 + $0x614] sm:$0xf0]  ;;  %v2289_v11 = vld [vmem:[#allocation4 + $0x88] sm:$0xf0] }
  0x75   :  { %1689 = vmatpush.bf16.msrb.mxu1 %v3104_v40  ;;  %v2337_v40 = vld [vmem:[#allocation4 + $0xe8] sm:$0xf0]  ;;  %v3000_v42 = vor.u32 %v3475_v30, %v2999_v29  ;;  %v2393_v29 = vld [vmem:[#allocation4 + $0x158] sm:$0xf0] }
  0x76   :  { %1677 = vmatpush.bf16.msrb.mxu0 %v3032_v41  ;;  %v3063_v41 = vld [vmem:[#allocation4 + $0x690] sm:$0xf]  ;;  %v2340_v51 = vor.u32 %v3308_v38, %v2337_v40  ;;  %v3338_v40 = vld [vmem:[#allocation4 + $0x1d4] sm:$0xf] }
  0x77   :  { %1705 = vmatpush.bf16.msrb.mxu2 %v3144_v45  ;;  %v3473_v45 = vld [vmem:[#allocation4 + $0x604] sm:$0xf0]  ;;  %v3064_v55 = vor.u32 %v3491_v43, %v3063_v41  ;;  %v2457_v41 = vld [vmem:[#allocation4 + $0x1d8] sm:$0xf0]  ;;  %v3320_v43 = vld [vmem:[#allocation4 + $0x144] sm:$0xf] }
  0x78   :  { %1716 = vmatpush.bf16.msrb.mxu3 %v2268_v46  ;;  %v3701_v46 = vpack.c.bf16 %v77_v31, %v77_v31  ;;  %v2992_v59 = vor.u32 %v3473_v45, %v2991_v44  ;;  %v3302_v31 = vld [vmem:[#allocation4 + $0xb4] sm:$0xf]  ;;  %v2385_v44 = vld [vmem:[#allocation4 + $0x148] sm:$0xf0]  ;;  %v2460_v50 = vor.u32 %v3338_v40, %v2457_v41 }
  0x79   :  { %1690 = vmatpush.bf16.msrb.mxu1 %v3096_v53  ;;  %v3326_v53 = vld [vmem:[#allocation4 + $0x174] sm:$0xf] }
  0x7a   :  { %1678 = vmatpush.bf16.msrb.mxu0 %v3024_v54  ;;  %v2409_v54 = vld [vmem:[#allocation4 + $0x178] sm:$0xf0]  ;;  %v3330_v41 = vld [vmem:[#allocation4 + $0x194] sm:$0xf] }
  0x7b   :  { %1706 = vmatpush.bf16.msrb.mxu2 %v3136_v57  ;;  %v3358_v57 = vld [vmem:[#allocation4 + $0x274] sm:$0xf]  ;;  %v2412_v0 = vor.u32 %v3326_v53, %v2409_v54  ;;  %v3336_v53 = vld [vmem:[#allocation4 + $0x1c4] sm:$0xf]  ;;  %v2449_v54 = vld [vmem:[#allocation4 + $0x1c8] sm:$0xf0] }
  0x7c   :  { %1717 = vmatpush.bf16.msrb.mxu3 %v2260_v58  ;;  %v2537_v58 = vld [vmem:[#allocation4 + $0x278] sm:$0xf0]  ;;  %v2452_v61 = vor.u32 %v3336_v53, %v2449_v54  ;;  %v3370_v53 = vld [vmem:[#allocation4 + $0x2d4] sm:$0xf] }
  0x7d   :  { %1691 = vmatpush.bf16.msrb.mxu1 %v3088_v1  ;;  %v3342_v1 = vld [vmem:[#allocation4 + $0x1f4] sm:$0xf]  ;;  %v2540_v4 = vor.u32 %v3358_v57, %v2537_v58  ;;  %v2377_v57 = vld [vmem:[#allocation4 + $0x138] sm:$0xf0] }
  0x7e   :  { %1679 = vmatpush.bf16.msrb.mxu0 %v3016_v2  ;;  %v2473_v2 = vld [vmem:[#allocation4 + $0x1f8] sm:$0xf0] }
  0x7f   :  { %1707 = vmatpush.bf16.msrb.mxu2 %v3128_v6  ;;  %v3324_v6 = vld [vmem:[#allocation4 + $0x164] sm:$0xf]  ;;  %v2476_v14 = vor.u32 %v3342_v1, %v2473_v2  ;;  %v3334_v1 = vld [vmem:[#allocation4 + $0x1b4] sm:$0xf]  ;;  %v2441_v2 = vld [vmem:[#allocation4 + $0x1b8] sm:$0xf0] }
  0x80   :  { %1718 = vmatpush.bf16.msrb.mxu3 %v2252_v7  ;;  %v2401_v7 = vld [vmem:[#allocation4 + $0x168] sm:$0xf0]  ;;  %v2585_v54 = vld [vmem:[#allocation4 + $0x2d8] sm:$0xf0] }
  0x81   :  { %1692 = vmatpush.bf16.msrb.mxu1 %v3080_v16  ;;  %v3356_v16 = vld [vmem:[#allocation4 + $0x264] sm:$0xf]  ;;  %v2404_v20 = vor.u32 %v3324_v6, %v2401_v7  ;;  %v2369_v6 = vld [vmem:[#allocation4 + $0x128] sm:$0xf0] }
  0x82   :  { %1680 = vmatpush.bf16.msrb.mxu0 %v3008_v21  ;;  %v3340_v21 = vld [vmem:[#allocation4 + $0x1e4] sm:$0xf]  ;;  %v2532_v30 = vor.u32 %v3356_v16, %v2529_v19  ;;  %v3374_v16 = vld [vmem:[#allocation4 + $0x2f4] sm:$0xf]  ;;  %v2601_v19 = vld [vmem:[#allocation4 + $0x2f8] sm:$0xf0] }
  0x83   :  { %1708 = vmatpush.bf16.msrb.mxu2 %v3120_v27  ;;  %v2324_v27 = vor.u32 %v3304_v12, %v2321_v13  ;;  %v2468_v35 = vor.u32 %v3340_v21, %v2465_v23  ;;  %v3348_v12 = vld [vmem:[#allocation4 + $0x224] sm:$0xf]  ;;  %v2444_v13 = vor.u32 %v3334_v1, %v2441_v2  ;;  %v2433_v23 = vld [vmem:[#allocation4 + $0x1a8] sm:$0xf0] }
  0x84   :  { %1719 = vmatpush.bf16.msrb.mxu3 %v2244_v28  ;;  %v3322_v28 = vld [vmem:[#allocation4 + $0x154] sm:$0xf]  ;;  %v3332_v21 = vld [vmem:[#allocation4 + $0x1a4] sm:$0xf]  ;;  %v2657_v2 = vld [vmem:[#allocation4 + $0x368] sm:$0xf0] }
  0x85   :  { %1693 = vmatpush.bf16.msrb.mxu1 %v3072_v37  ;;  %v2521_v37 = vld [vmem:[#allocation4 + $0x258] sm:$0xf0]  ;;  %v2396_v38 = vor.u32 %v3322_v28, %v2393_v29  ;;  %v3314_v28 = vld [vmem:[#allocation4 + $0x114] sm:$0xf]  ;;  %v3388_v1 = vld [vmem:[#allocation4 + $0x364] sm:$0xf] }
  0x86   :  { %1681 = vmatpush.bf16.msrb.mxu0 %v3000_v42  ;;  %3165 = vmatmul.msk.bf16.vlgmr.msrb.gmra.mxu2 %vm1515_vm0, %v3701_v46  ;;  %v2524_v45 = vor.u32 %v3354_v36, %v2521_v37  ;;  %v2361_v29 = vld [vmem:[#allocation4 + $0x118] sm:$0xf0]  ;;  %v3372_v37 = vld [vmem:[#allocation4 + $0x2e4] sm:$0xf] }
  0x87   :  { %1727 = vmatpush.bf16.msra.mxu2 %v2348_v33  ;;  %v2313_v33 = vld [vmem:[#allocation4 + $0xb8] sm:$0xf0]  ;;  %v2364_v40 = vor.u32 %v3314_v28, %v2361_v29  ;;  %v3418_v29 = vld [vmem:[#allocation4 + $0x454] sm:$0xf] }
  0x88   :  { %1720 = vmatpush.bf16.msrb.mxu3 %v2236_v47  ;;  %v2316_v42 = vor.u32 %v3302_v31, %v2313_v33  ;;  %v3300_v47 = vld [vmem:[#allocation4 + $0xa4] sm:$0xf]  ;;  %v2604_v31 = vor.u32 %v3374_v16, %v2601_v19  ;;  %v3346_v33 = vld [vmem:[#allocation4 + $0x214] sm:$0xf]  ;;  %v2489_v36 = vld [vmem:[#allocation4 + $0x218] sm:$0xf0] }
  0x89   :  { %1694 = vmatpush.bf16.msrb.mxu1 %v3064_v55  ;;  %v2308_v55 = vor.u32 %v3300_v47, %v2305_v49  ;;  %v2492_v47 = vor.u32 %v3346_v33, %v2489_v36  ;;  %v3386_v19 = vld [vmem:[#allocation4 + $0x354] sm:$0xf] }
  0x8a   :  { %1682 = vmatpush.bf16.msrb.mxu0 %v2992_v59  ;;  %v3298_v59 = vld [vmem:[#allocation4 + $0x94] sm:$0xf] }
  0x8b   :  { %1728 = vmatpush.bf16.msra.mxu2 %v2340_v51  ;;  %v3352_v51 = vld [vmem:[#allocation4 + $0x244] sm:$0xf]  ;;  %v3402_v33 = vld [vmem:[#allocation4 + $0x3d4] sm:$0xf] }
  0x8c   :  { %1721 = vmatpush.bf16.msrb.mxu3 %v2228_v63  ;;  %v2516_v58 = vor.u32 %v3352_v51, %v2513_v52  ;;  %v2505_v63 = vld [vmem:[#allocation4 + $0x238] sm:$0xf0]  ;;  %v3390_v51 = vld [vmem:[#allocation4 + $0x374] sm:$0xf] }
  0x8d   :  { %1695 = vmatpush.bf16.msrb.mxu1 %v3056_v8  ;;  %1683 = vmatmul.bf16.vlgmr.msrb.gmra.mxu0 %v3705_v9  ;;  %v2508_v7 = vor.u32 %v3350_v62, %v2505_v63  ;;  %v3296_v8 = vld [vmem:[#allocation4 + $0x84] sm:$0xf]  ;;  %v2665_v52 = vld [vmem:[#allocation4 + $0x378] sm:$0xf0] }
  0x8e   :  { %1740 = vmatpush.bf16.msra.mxu0 %v2412_v0  ;;  %v2380_v0 = vor.u32 %v3318_v56, %v2377_v57  ;;  %v2793_v57 = vld [vmem:[#allocation4 + $0x478] sm:$0xf0] }
  0x8f   :  { %1729 = vmatpush.bf16.msra.mxu2 %v2332_v3  ;;  %1722 = vmatmul.bf16.vlgmr.msrb.gmra.mxu3 %v3667_v10  ;;  %v2388_v10 = vor.u32 %v3320_v43, %v2385_v44  ;;  %v2300_v3 = vor.u32 %v3298_v59, %v2297_v60  ;;  %v3312_v43 = vld [vmem:[#allocation4 + $0x104] sm:$0xf]  ;;  %v2353_v44 = vld [vmem:[#allocation4 + $0x108] sm:$0xf0]  ;;  %v2668_v60 = vor.u32 %v3390_v51, %v2665_v52  ;;  %v2729_v62 = vld [vmem:[#allocation4 + $0x3f8] sm:$0xf0] }
  0x90   :  { %1766 = vmatpush.bf16.msra.mxu3 %v2540_v4  ;;  %1696 = vmatmul.bf16.vlgmr.msrb.gmra.mxu1 %v3707_v26  ;;  %v3316_v4 = vld [vmem:[#allocation4 + $0x124] sm:$0xf]  ;;  %v2356_v56 = vor.u32 %v3312_v43, %v2353_v44  ;;  %v2417_v59 = vld [vmem:[#allocation4 + $0x188] sm:$0xf0]  ;;  %v2633_v51 = vld [vmem:[#allocation4 + $0x338] sm:$0xf0] }
  0x91   :  { %1753 = vmatpush.bf16.msra.mxu1 %v2476_v14  ;;  %v2497_v14 = vld [vmem:[#allocation4 + $0x228] sm:$0xf0]  ;;  %v3416_v44 = vld [vmem:[#allocation4 + $0x444] sm:$0xf] }
  0x92   :  { %1741 = vmatpush.bf16.msra.mxu0 %v2404_v20  ;;  %v2372_v20 = vor.u32 %v3316_v4, %v2369_v6  ;;  %v3368_v6 = vld [vmem:[#allocation4 + $0x2c4] sm:$0xf] }
  0x93   :  { %1730 = vmatpush.bf16.msra.mxu2 %v2324_v27  ;;  %v2292_v27 = vor.u32 %v3296_v8, %v2289_v11  ;;  %v3420_v11 = vld [vmem:[#allocation4 + $0x464] sm:$0xf] }
  0x94   :  { %1767 = vmatpush.bf16.msra.mxu3 %v2532_v30  ;;  %v2500_v30 = vor.u32 %v3348_v12, %v2497_v14  ;;  %v2785_v12 = vld [vmem:[#allocation4 + $0x468] sm:$0xf0] }
  0x95   :  { %1754 = vmatpush.bf16.msra.mxu1 %v2468_v35  ;;  %v2436_v35 = vor.u32 %v3332_v21, %v2433_v23  ;;  %v2721_v14 = vld [vmem:[#allocation4 + $0x3e8] sm:$0xf0]  ;;  %v2788_v21 = vor.u32 %v3420_v11, %v2785_v12  ;;  %v3366_v23 = vld [vmem:[#allocation4 + $0x2b4] sm:$0xf]  ;;  %v3396_v11 = vld [vmem:[#allocation4 + $0x3a4] sm:$0xf] }
  0x96   :  { %1742 = vmatpush.bf16.msra.mxu0 %v2396_v38  ;;  %v2593_v38 = vld [vmem:[#allocation4 + $0x2e8] sm:$0xf0] }
  0x97   :  { %1731 = vmatpush.bf16.msra.mxu2 %v2316_v42  ;;  %v2425_v42 = vld [vmem:[#allocation4 + $0x198] sm:$0xf0]  ;;  %v2596_v49 = vor.u32 %v3372_v37, %v2593_v38  ;;  %v3384_v37 = vld [vmem:[#allocation4 + $0x344] sm:$0xf]  ;;  %v2641_v38 = vld [vmem:[#allocation4 + $0x348] sm:$0xf0] }
  0x98   :  { %1768 = vmatpush.bf16.msra.mxu3 %v2524_v45  ;;  %v3344_v45 = vld [vmem:[#allocation4 + $0x204] sm:$0xf]  ;;  %v2689_v12 = vld [vmem:[#allocation4 + $0x3a8] sm:$0xf0] }
  0x99   :  { %1755 = vmatpush.bf16.msra.mxu1 %v2460_v50  ;;  %v2481_v50 = vld [vmem:[#allocation4 + $0x208] sm:$0xf0] }
  0x9a   :  { %1743 = vmatpush.bf16.msra.mxu0 %v2388_v10  ;;  %v2428_v10 = vor.u32 %v3330_v41, %v2425_v42  ;;  %v2484_v63 = vor.u32 %v3344_v45, %v2481_v50  ;;  %v3364_v41 = vld [vmem:[#allocation4 + $0x2a4] sm:$0xf]  ;;  %v2561_v42 = vld [vmem:[#allocation4 + $0x2a8] sm:$0xf0]  ;;  %v2644_v45 = vor.u32 %v3384_v37, %v2641_v38  ;;  %v3382_v50 = vld [vmem:[#allocation4 + $0x334] sm:$0xf] }
  0x9b   :  { %1732 = vmatpush.bf16.msra.mxu2 %v2308_v55  ;;  %v3422_v55 = vld [vmem:[#allocation4 + $0x474] sm:$0xf]  ;;  %v2609_v37 = vld [vmem:[#allocation4 + $0x308] sm:$0xf0]  ;;  %v3408_v38 = vld [vmem:[#allocation4 + $0x404] sm:$0xf] }
  0x9c   :  { %1769 = vmatpush.bf16.msra.mxu3 %v2516_v58  ;;  %v3328_v58 = vld [vmem:[#allocation4 + $0x184] sm:$0xf] }
  0x9d   :  { %1756 = vmatpush.bf16.msra.mxu1 %v2452_v61  ;;  %v3406_v61 = vld [vmem:[#allocation4 + $0x3f4] sm:$0xf]  ;;  %v2420_v4 = vor.u32 %v3328_v58, %v2417_v59  ;;  %v2697_v58 = vld [vmem:[#allocation4 + $0x3b8] sm:$0xf0] }
  0x9e   :  { %1744 = vmatpush.bf16.msra.mxu0 %v2380_v0  ;;  %v2588_v0 = vor.u32 %v3370_v53, %v2585_v54  ;;  %v2732_v8 = vor.u32 %v3406_v61, %v2729_v62  ;;  %v3414_v54 = vld [vmem:[#allocation4 + $0x434] sm:$0xf]  ;;  %v2625_v61 = vld [vmem:[#allocation4 + $0x328] sm:$0xf0] }
  0x9f   :  { %1733 = vmatpush.bf16.msra.mxu2 %v2300_v3  ;;  %v2796_v3 = vor.u32 %v3422_v55, %v2793_v57  ;;  %v2761_v55 = vld [vmem:[#allocation4 + $0x438] sm:$0xf0]  ;;  %v3398_v57 = vld [vmem:[#allocation4 + $0x3b4] sm:$0xf] }
  0xa0   :  { %1770 = vmatpush.bf16.msra.mxu3 %v2508_v7  ;;  %v2577_v7 = vld [vmem:[#allocation4 + $0x2c8] sm:$0xf0]  ;;  %v2764_v62 = vor.u32 %v3414_v54, %v2761_v55  ;;  %v3470_v54 = vld [vmem:[#allocation4 + $0x5f4] sm:$0xf]  ;;  %v2985_v55 = vld [vmem:[#allocation4 + $0x5f8] sm:$0xf0] }
  0xa1   :  { %1757 = vmatpush.bf16.msra.mxu1 %v2444_v13  ;;  %v3404_v13 = vld [vmem:[#allocation4 + $0x3e4] sm:$0xf]  ;;  %v2580_v16 = vor.u32 %v3368_v6, %v2577_v7  ;;  %v2857_v6 = vld [vmem:[#allocation4 + $0x4f8] sm:$0xf0] }
  0xa2   :  { %1745 = vmatpush.bf16.msra.mxu0 %v2372_v20  ;;  %v2649_v20 = vld [vmem:[#allocation4 + $0x358] sm:$0xf0]  ;;  %v2724_v28 = vor.u32 %v3404_v13, %v2721_v14  ;;  %v3378_v13 = vld [vmem:[#allocation4 + $0x314] sm:$0xf] }
  0xa3   :  { %1734 = vmatpush.bf16.msra.mxu2 %v2292_v27  ;;  %v2569_v27 = vld [vmem:[#allocation4 + $0x2b8] sm:$0xf0] }
  0xa4   :  { %1771 = vmatpush.bf16.msra.mxu3 %v2500_v30  ;;  %v2777_v30 = vld [vmem:[#allocation4 + $0x458] sm:$0xf0]  ;;  %v2572_v36 = vor.u32 %v3366_v23, %v2569_v27  ;;  %v3436_v27 = vld [vmem:[#allocation4 + $0x4e4] sm:$0xf] }
  0xa5   :  { %1758 = vmatpush.bf16.msra.mxu1 %v2436_v35  ;;  %v2713_v35 = vld [vmem:[#allocation4 + $0x3d8] sm:$0xf0] }
  0xa6   :  { %1746 = vmatpush.bf16.msra.mxu0 %v2364_v40  ;;  %1735 = vmatmul.bf16.vlgmr.msra.gmra.mxu2 %v3673_v22  ;;  %v2660_v22 = vor.u32 %v3388_v1, %v2657_v2  ;;  %v2780_v40 = vor.u32 %v3418_v29, %v2777_v30  ;;  %v2716_v43 = vor.u32 %v3402_v33, %v2713_v35  ;;  %v3412_v1 = vld [vmem:[#allocation4 + $0x424] sm:$0xf]  ;;  %v2617_v14 = vld [vmem:[#allocation4 + $0x318] sm:$0xf0] }
  0xa7   :  { %1779 = vmatpush.bf16.msrb.mxu2 %v2604_v31  ;;  %v2652_v31 = vor.u32 %v3386_v19, %v2649_v20  ;;  %v2700_v2 = vor.u32 %v3398_v57, %v2697_v58  ;;  %v3410_v20 = vld [vmem:[#allocation4 + $0x414] sm:$0xf]  ;;  %v2745_v23 = vld [vmem:[#allocation4 + $0x418] sm:$0xf0]  ;;  %v2620_v30 = vor.u32 %v3378_v13, %v2617_v14  ;;  %v3452_v58 = vld [vmem:[#allocation4 + $0x564] sm:$0xf] }
  0xa8   :  { %1772 = vmatpush.bf16.msra.mxu3 %v2492_v47  ;;  %v3400_v47 = vld [vmem:[#allocation4 + $0x3c4] sm:$0xf]  ;;  %v2681_v33 = vld [vmem:[#allocation4 + $0x398] sm:$0xf0]  ;;  %v3430_v14 = vld [vmem:[#allocation4 + $0x4b4] sm:$0xf] }
  0xa9   :  { %1759 = vmatpush.bf16.msra.mxu1 %v2428_v10  ;;  %v3362_v10 = vld [vmem:[#allocation4 + $0x294] sm:$0xf] }
  0xaa   :  { %1747 = vmatpush.bf16.msra.mxu0 %v2356_v56  ;;  %v2636_v56 = vor.u32 %v3382_v50, %v2633_v51  ;;  %v3716_v7 = vpop.f32.mrf.mxu0  ;;  %v3049_v51 = vld [vmem:[#allocation4 + $0x678] sm:$0xf0] }
  0xab   :  { %1780 = vmatpush.bf16.msrb.mxu2 %v2596_v49  ;;  %v2705_v49 = vld [vmem:[#allocation4 + $0x3c8] sm:$0xf0] }
  0xac   :  { %1773 = vmatpush.bf16.msra.mxu3 %v2484_v63  ;;  %v2708_v53 = vor.u32 %v3400_v47, %v2705_v49  ;;  %v3360_v63 = vld [vmem:[#allocation4 + $0x284] sm:$0xf]  ;;  %v2841_v47 = vld [vmem:[#allocation4 + $0x4d8] sm:$0xf0]  ;;  %v3486_v49 = vld [vmem:[#allocation4 + $0x674] sm:$0xf] }
  0xad   :  { %1760 = vmatpush.bf16.msra.mxu1 %v2420_v4  ;;  %1748 = vmatmul.bf16.vlgmr.msra.gmra.mxu0 %v3665_v5  ;;  %v2769_v5 = vld [vmem:[#allocation4 + $0x448] sm:$0xf0]  ;;  %v3438_v4 = vld [vmem:[#allocation4 + $0x4f4] sm:$0xf]  ;;  %v3718_v29 = vpop.f32.mrf.mxu1 }
  0xae   :  { %1792 = vmatpush.bf16.msrb.mxu0 %v2668_v60  ;;  %v2772_v52 = vor.u32 %v3416_v44, %v2769_v5  ;;  %v3380_v60 = vld [vmem:[#allocation4 + $0x324] sm:$0xf]  ;;  %v2860_v19 = vor.u32 %v3438_v4, %v2857_v6  ;;  %v2921_v44 = vld [vmem:[#allocation4 + $0x578] sm:$0xf0] }
  0xaf   :  { %1781 = vmatpush.bf16.msrb.mxu2 %v2588_v0  ;;  %1774 = vmatmul.bf16.vlgmr.msra.gmra.mxu3 %v3679_v34  ;;  %v2564_v34 = vor.u32 %v3364_v41, %v2561_v42  ;;  %v2545_v0 = vld [vmem:[#allocation4 + $0x288] sm:$0xf0]  ;;  %v3468_v6 = vld [vmem:[#allocation4 + $0x5e4] sm:$0xf] }
  0xb0   :  { %1818 = vmatpush.bf16.msrb.mxu3 %v2796_v3  ;;  %1761 = vmatmul.bf16.vlgmr.msra.gmra.mxu1 %v3670_v15  ;;  %v2553_v15 = vld [vmem:[#allocation4 + $0x298] sm:$0xf0]  ;;  %v2753_v3 = vld [vmem:[#allocation4 + $0x428] sm:$0xf0] }
  0xb1   :  { %1805 = vmatpush.bf16.msrb.mxu1 %v2732_v8  ;;  %v2556_v59 = vor.u32 %v3362_v10, %v2553_v15  ;;  %v2628_v8 = vor.u32 %v3380_v60, %v2625_v61  ;;  %v3720_v35 = vpop.f32.mrf.mxu2  ;;  %v2737_v42 = vld [vmem:[#allocation4 + $0x408] sm:$0xf0]  ;;  %v3052_v60 = vor.u32 %v3486_v49, %v3049_v51  ;;  %v3426_v49 = vld [vmem:[#allocation4 + $0x494] sm:$0xf] }
  0xb2   :  { %1793 = vmatpush.bf16.msrb.mxu0 %v2660_v22  ;;  %v2548_v22 = vor.u32 %v3360_v63, %v2545_v0  ;;  %v2673_v10 = vld [vmem:[#allocation4 + $0x388] sm:$0xf0]  ;;  %v3723_v15 = vpop.f32.mrf.mxu3  ;;  %v2988_v0 = vor.u32 %v3470_v54, %v2985_v55  ;;  %v3478_v51 = vld [vmem:[#allocation4 + $0x634] sm:$0xf]  ;;  %v2953_v55 = vld [vmem:[#allocation4 + $0x5b8] sm:$0xf0] }
  0xb3   :  { %1782 = vmatpush.bf16.msrb.mxu2 %v2580_v16  ;;  %v2756_v16 = vor.u32 %v3412_v1, %v2753_v3  ;;  %v2833_v63 = vld [vmem:[#allocation4 + $0x4c8] sm:$0xf0]  ;;  %v3484_v1 = vld [vmem:[#allocation4 + $0x664] sm:$0xf]  ;;  %v3462_v54 = vld [vmem:[#allocation4 + $0x5b4] sm:$0xf] }
  0xb4   :  { %1819 = vmatpush.bf16.msrb.mxu3 %v2788_v21  ;;  %v2692_v21 = vor.u32 %v3396_v11, %v2689_v12  ;;  %v3450_v12 = vld [vmem:[#allocation4 + $0x554] sm:$0xf] }
  0xb5   :  { %1806 = vmatpush.bf16.msrb.mxu1 %v2724_v28  ;;  %v2849_v28 = vld [vmem:[#allocation4 + $0x4e8] sm:$0xf0] }
  0xb6   :  { %1794 = vmatpush.bf16.msrb.mxu0 %v2652_v31  ;;  %v3394_v31 = vld [vmem:[#allocation4 + $0x394] sm:$0xf]  ;;  %v2852_v41 = vor.u32 %v3436_v27, %v2849_v28 }
  0xb7   :  { %1783 = vmatpush.bf16.msrb.mxu2 %v2572_v36  ;;  %v3376_v36 = vld [vmem:[#allocation4 + $0x304] sm:$0xf]  ;;  %v2684_v5 = vor.u32 %v3394_v31, %v2681_v33  ;;  %v3466_v28 = vld [vmem:[#allocation4 + $0x5d4] sm:$0xf] }
  0xb8   :  { %1820 = vmatpush.bf16.msrb.mxu3 %v2780_v40  ;;  %v2748_v40 = vor.u32 %v3410_v20, %v2745_v23  ;;  %v2612_v50 = vor.u32 %v3376_v36, %v2609_v37  ;;  %v3482_v20 = vld [vmem:[#allocation4 + $0x654] sm:$0xf]  ;;  %v3448_v33 = vld [vmem:[#allocation4 + $0x544] sm:$0xf]  ;;  %v2897_v36 = vld [vmem:[#allocation4 + $0x548] sm:$0xf0] }
  0xb9   :  { %1807 = vmatpush.bf16.msrb.mxu1 %v2716_v43  ;;  %v3454_v43 = vld [vmem:[#allocation4 + $0x574] sm:$0xf]  ;;  %v1556_v3 = vpop.f32.mrf.mxu2 }
  0xba   :  { %1795 = vmatpush.bf16.msrb.mxu0 %v2644_v45  ;;  %v3434_v45 = vld [vmem:[#allocation4 + $0x4d4] sm:$0xf]  ;;  %v1569_v23 = vpop.f32.mrf.mxu3 }
  0xbb   :  { %1784 = vmatpush.bf16.msrb.mxu2 %v2564_v34  ;;  %v1530_v34 = vpop.f32.mrf.mxu0  ;;  %v2844_v57 = vor.u32 %v3434_v45, %v2841_v47  ;;  %v3446_v45 = vld [vmem:[#allocation4 + $0x534] sm:$0xf]  ;;  %v2889_v47 = vld [vmem:[#allocation4 + $0x538] sm:$0xf0]  ;;  %v3500_v23 = vld [vmem:[#allocation4 + $0x6e4] sm:$0xf] }
  0xbc   :  { %1821 = vmatpush.bf16.msrb.mxu3 %v2772_v52  ;;  %v3392_v52 = vld [vmem:[#allocation4 + $0x384] sm:$0xf]  ;;  %v2809_v34 = vld [vmem:[#allocation4 + $0x498] sm:$0xf0] }
  0xbd   :  { %1808 = vmatpush.bf16.msrb.mxu1 %v2708_v53  ;;  %v2924_v53 = vor.u32 %v3454_v43, %v2921_v44  ;;  %v2676_v61 = vor.u32 %v3392_v52, %v2673_v10  ;;  %v2900_v43 = vor.u32 %v3448_v33, %v2897_v36  ;;  %v2961_v44 = vld [vmem:[#allocation4 + $0x5c8] sm:$0xf0]  ;;  %v3017_v52 = vld [vmem:[#allocation4 + $0x638] sm:$0xf0]  ;;  %v3739_v36 = vld [vmem:[%s3856_s2] sm:$0x3] }
  0xbe   :  { %1796 = vmatpush.bf16.msrb.mxu0 %v2636_v56  ;;  %v2740_v56 = vor.u32 %v3408_v38, %v2737_v42  ;;  %v3428_v38 = vld [vmem:[#allocation4 + $0x4a4] sm:$0xf]  ;;  %v3025_v42 = vld [vmem:[#allocation4 + $0x648] sm:$0xf0]  ;;  %v2937_v33 = vld [vmem:[#allocation4 + $0x598] sm:$0xf0] }
  0xbf   :  { %1785 = vmatpush.bf16.msrb.mxu2 %v2556_v59  ;;  %v2913_v59 = vld [vmem:[#allocation4 + $0x568] sm:$0xf0] }
  0xc0   :  { %1822 = vmatpush.bf16.msrb.mxu3 %v2764_v62  ;;  %v3432_v62 = vld [vmem:[#allocation4 + $0x4c4] sm:$0xf]  ;;  %v2916_v4 = vor.u32 %v3452_v58, %v2913_v59  ;;  %v2881_v58 = vld [vmem:[#allocation4 + $0x528] sm:$0xf0]  ;;  %v3020_v59 = vor.u32 %v3478_v51, %v3017_v52 }
  0xc1   :  { %1809 = vmatpush.bf16.msrb.mxu1 %v2700_v2  ;;  %v3041_v2 = vld [vmem:[#allocation4 + $0x668] sm:$0xf0]  ;;  %v2836_v11 = vor.u32 %v3432_v62, %v2833_v63  ;;  %v3476_v62 = vld [vmem:[#allocation4 + $0x624] sm:$0xf] }
  0xc2   :  { %1797 = vmatpush.bf16.msrb.mxu0 %v2628_v8  ;;  %v2977_v8 = vld [vmem:[#allocation4 + $0x5e8] sm:$0xf0]  ;;  %v3044_v13 = vor.u32 %v3484_v1, %v3041_v2  ;;  %v3502_v1 = vld [vmem:[#allocation4 + $0x6f4] sm:$0xf]  ;;  %v3113_v2 = vld [vmem:[#allocation4 + $0x6f8] sm:$0xf0] }
  0xc3   :  { %1786 = vmatpush.bf16.msrb.mxu2 %v2548_v22  ;;  %v2905_v22 = vld [vmem:[#allocation4 + $0x558] sm:$0xf0] }
  0xc4   :  { %1823 = vmatpush.bf16.msrb.mxu3 %v2756_v16  ;;  %v2825_v16 = vld [vmem:[#allocation4 + $0x4b8] sm:$0xf0]  ;;  %v2908_v27 = vor.u32 %v3450_v12, %v2905_v22  ;;  %v3442_v12 = vld [vmem:[#allocation4 + $0x514] sm:$0xf] }
  0xc5   :  { %1810 = vmatpush.bf16.msrb.mxu1 %v2692_v21  ;;  %v3033_v21 = vld [vmem:[#allocation4 + $0x658] sm:$0xf0]  ;;  %v2828_v31 = vor.u32 %v3430_v14, %v2825_v16  ;;  %v3116_v14 = vor.u32 %v3502_v1, %v3113_v2  ;;  %v3474_v16 = vld [vmem:[#allocation4 + $0x614] sm:$0xf] }
  0xc6   :  { %1798 = vmatpush.bf16.msrb.mxu0 %v2620_v30  ;;  %1787 = vmatmul.bf16.vlgmr.msrb.gmra.mxu2 %v3684_v48  ;;  %v1543_v48 = vpop.f32.mrf.mxu1  ;;  %v2969_v30 = vld [vmem:[#allocation4 + $0x5d8] sm:$0xf0]  ;;  %v3036_v37 = vor.u32 %v3482_v20, %v3033_v21  ;;  %v3494_v2 = vld [vmem:[#allocation4 + $0x6b4] sm:$0xf] }
  0xc7   :  { %1831 = vmatpush.bf16.msra.mxu2 %v2860_v19  ;;  %v2980_v19 = vor.u32 %v3468_v6, %v2977_v8  ;;  %v2956_v48 = vor.u32 %v3462_v54, %v2953_v55  ;;  %v2945_v6 = vld [vmem:[#allocation4 + $0x5a8] sm:$0xf0]  ;;  %v2873_v22 = vld [vmem:[#allocation4 + $0x518] sm:$0xf0]  ;;  %v3512_v55 = vld [vmem:[#allocation4 + $0x744] sm:$0xf] }
  0xc8   :  { %1824 = vmatpush.bf16.msrb.mxu3 %v2748_v40  ;;  %v2817_v40 = vld [vmem:[#allocation4 + $0x4a8] sm:$0xf0]  ;;  %v3001_v21 = vld [vmem:[#allocation4 + $0x618] sm:$0xf0] }
  0xc9   :  { %1811 = vmatpush.bf16.msrb.mxu1 %v2684_v5  ;;  %v2820_v5 = vor.u32 %v3428_v38, %v2817_v40  ;;  %v2865_v38 = vld [vmem:[#allocation4 + $0x508] sm:$0xf0]  ;;  %v3004_v40 = vor.u32 %v3474_v16, %v3001_v21  ;;  %v3145_v1 = vld [vmem:[#allocation4 + $0x738] sm:$0xf0] }
  0xca   :  { %1799 = vmatpush.bf16.msrb.mxu0 %v2612_v50  ;;  %v3728_v10 = vpop.f32.mrf.mxu0  ;;  %v3129_v21 = vld [vmem:[#allocation4 + $0x718] sm:$0xf0] }
  0xcb   :  { %1832 = vmatpush.bf16.msra.mxu2 %v2852_v41  ;;  %v3480_v41 = vld [vmem:[#allocation4 + $0x644] sm:$0xf] }
  0xcc   :  { %1825 = vmatpush.bf16.msrb.mxu3 %v2740_v56  ;;  %v2812_v56 = vor.u32 %v3426_v49, %v2809_v34  ;;  %v3456_v34 = vld [vmem:[#allocation4 + $0x584] sm:$0xf] }
  0xcd   :  { %1812 = vmatpush.bf16.msrb.mxu1 %v2676_v61  ;;  %1800 = vmatmul.bf16.vlgmr.msrb.gmra.mxu0 %v3677_v32  ;;  %v2972_v32 = vor.u32 %v3466_v28, %v2969_v30  ;;  %v2801_v61 = vld [vmem:[#allocation4 + $0x488] sm:$0xf0]  ;;  %v2876_v30 = vor.u32 %v3442_v12, %v2873_v22  ;;  %v3508_v12 = vld [vmem:[#allocation4 + $0x724] sm:$0xf] }
  0xce   :  { %1844 = vmatpush.bf16.msra.mxu0 %v2924_v53  ;;  %v2892_v53 = vor.u32 %v3446_v45, %v2889_v47  ;;  %v3730_v63 = vpop.f32.mrf.mxu1  ;;  %v3498_v45 = vld [vmem:[#allocation4 + $0x6d4] sm:$0xf]  ;;  %v3097_v47 = vld [vmem:[#allocation4 + $0x6d8] sm:$0xf0]  ;;  %v3137_v22 = vld [vmem:[#allocation4 + $0x728] sm:$0xf0] }
  0xcf   :  { %1833 = vmatpush.bf16.msra.mxu2 %v2844_v57  ;;  %1826 = vmatmul.bf16.vlgmr.msrb.gmra.mxu3 %v3689_v17  ;;  %v3464_v17 = vld [vmem:[#allocation4 + $0x5c4] sm:$0xf]  ;;  %v3100_v54 = vor.u32 %v3498_v45, %v3097_v47  ;;  %v3140_v16 = vor.u32 %v3508_v12, %v3137_v22  ;;  %v3518_v47 = vld [vmem:[%s3857_s3 + $0x10] sm:$0xff] }
  0xd0   :  { %1870 = vmatpush.bf16.msra.mxu3 %v3052_v60  ;;  %1813 = vmatmul.bf16.vlgmr.msrb.gmra.mxu1 %v3681_v39  ;;  %v3028_v39 = vor.u32 %v3480_v41, %v3025_v42  ;;  %v2964_v50 = vor.u32 %v3464_v17, %v2961_v44  ;;  %v3444_v57 = vld [vmem:[#allocation4 + $0x524] sm:$0xf]  ;;  %v3514_v42 = vld [vmem:[#allocation4 + $0x754] sm:$0xf] }
  0xd1   :  { %1857 = vmatpush.bf16.msra.mxu1 %v2988_v0  ;;  %v3424_v60 = vld [vmem:[#allocation4 + $0x484] sm:$0xf]  ;;  %v3009_v0 = vld [vmem:[#allocation4 + $0x628] sm:$0xf0]  ;;  %v2884_v3 = vor.u32 %v3444_v57, %v2881_v58  ;;  %v3732_v8 = vpop.f32.mrf.mxu2 }
  0xd2   :  { %1845 = vmatpush.bf16.msra.mxu0 %v2916_v4  ;;  %v3460_v4 = vld [vmem:[#allocation4 + $0x5a4] sm:$0xf]  ;;  %v1582_v28 = vpop.f32.mrf.mxu0 }
  0xd3   :  { %1834 = vmatpush.bf16.msra.mxu2 %v2836_v11  ;;  %v2804_v11 = vor.u32 %v3424_v60, %v2801_v61  ;;  %v2948_v20 = vor.u32 %v3460_v4, %v2945_v6  ;;  %v3472_v41 = vld [vmem:[#allocation4 + $0x604] sm:$0xf]  ;;  %v3089_v60 = vld [vmem:[#allocation4 + $0x6c8] sm:$0xf0] }
  0xd4   :  { %1871 = vmatpush.bf16.msra.mxu3 %v3044_v13  ;;  %v3012_v13 = vor.u32 %v3476_v62, %v3009_v0  ;;  %v3510_v0 = vld [vmem:[#allocation4 + $0x734] sm:$0xf] }
  0xd5   :  { %1858 = vmatpush.bf16.msra.mxu1 %v2980_v19  ;;  %v3734_v19 = vpop.f32.mrf.mxu3  ;;  %v3148_v6 = vor.u32 %v3510_v0, %v3145_v1 }
  0xd6   :  { %1846 = vmatpush.bf16.msra.mxu0 %v2908_v27  ;;  %v3105_v27 = vld [vmem:[#allocation4 + $0x6e8] sm:$0xf0]  ;;  %v1595_v17 = vpop.f32.mrf.mxu1 }
  0xd7   :  { %1835 = vmatpush.bf16.msra.mxu2 %v2828_v31  ;;  %v3458_v31 = vld [vmem:[#allocation4 + $0x594] sm:$0xf] }
  0xd8   :  { %1872 = vmatpush.bf16.msra.mxu3 %v3036_v37  ;;  %v3440_v37 = vld [vmem:[#allocation4 + $0x504] sm:$0xf]  ;;  %v2940_v44 = vor.u32 %v3458_v31, %v2937_v33 }
  0xd9   :  { %1859 = vmatpush.bf16.msra.mxu1 %v2972_v32  ;;  %v3108_v32 = vor.u32 %v3500_v23, %v3105_v27  ;;  %v2868_v49 = vor.u32 %v3440_v37, %v2865_v38  ;;  %v1608_v51 = vpop.f32.mrf.mxu2  ;;  %v3065_v23 = vld [vmem:[#allocation4 + $0x698] sm:$0xf0]  ;;  %v3504_v37 = vld [vmem:[#allocation4 + $0x704] sm:$0xf]  ;;  %v3121_v38 = vld [vmem:[#allocation4 + $0x708] sm:$0xf0] }
  0xda   :  { %1847 = vmatpush.bf16.msra.mxu0 %v2900_v43  ;;  %v3161_v43 = vld [vmem:[#allocation4 + $0x758] sm:$0xf0]  ;;  %v3516_v51 = vld [vmem:[%s3857_s3] sm:$0xff] }
  0xdb   :  { %1836 = vmatpush.bf16.msra.mxu2 %v2820_v5  ;;  %v2993_v5 = vld [vmem:[#allocation4 + $0x608] sm:$0xf0]  ;;  %v3164_v52 = vor.u32 %v3514_v42, %v3161_v43  ;;  %v3124_v42 = vor.u32 %v3504_v37, %v3121_v38  ;;  %v3525_v37 = vld [vmem:[%s3857_s3 + $0x48] sm:$0xff] }
  0xdc   :  { %1873 = vmatpush.bf16.msra.mxu3 %v3028_v39  ;;  %v331_v39 = vperm.slane %v3739_v36, 0 }
  0xdd   :  { %1860 = vmatpush.bf16.msra.mxu1 %v2964_v50  ;;  %v2929_v50 = vld [vmem:[#allocation4 + $0x588] sm:$0xf0]  ;;  %v1621_v57 = vpop.f32.mrf.mxu3 }
  0xde   :  { %1848 = vmatpush.bf16.msra.mxu0 %v2892_v53  ;;  %v2996_v53 = vor.u32 %v3472_v41, %v2993_v5  ;;  %v2932_v58 = vor.u32 %v3456_v34, %v2929_v50  ;;  %v1529_v61 = vadd.f32 %v3716_v7, %v331_v39  ;;  %v3522_v7 = vld [vmem:[%s3857_s3 + $0x30] sm:$0xff] }
  0xdf   :  { %1837 = vmatpush.bf16.msra.mxu2 %v2812_v56  ;;  %v3153_v56 = vld [vmem:[#allocation4 + $0x748] sm:$0xf0] }
  0xe0   :  { %1874 = vmatpush.bf16.msra.mxu3 %v3020_v59  ;;  %v3496_v59 = vld [vmem:[#allocation4 + $0x6c4] sm:$0xf]  ;;  %v3156_v62 = vor.u32 %v3512_v55, %v3153_v56  ;;  %v1542_v4 = vadd.f32 %v3718_v29, %v1529_v61  ;;  %v3521_v29 = vld [vmem:[%s3857_s3 + $0x28] sm:$0xff] }
  0xe1   :  { %1861 = vmatpush.bf16.msra.mxu1 %v2956_v48  ;;  %v3092_v48 = vor.u32 %v3496_v59, %v3089_v60 }
  0xe2   :  { %1849 = vmatpush.bf16.msra.mxu0 %v2884_v3  ;;  %v3081_v3 = vld [vmem:[#allocation4 + $0x6b8] sm:$0xf0] }
  0xe3   :  { %1838 = vmatpush.bf16.msra.mxu2 %v2804_v11  ;;  %v3084_v11 = vor.u32 %v3494_v2, %v3081_v3 }
  0xe4   :  { %1875 = vmatpush.bf16.msra.mxu3 %v3012_v13  ;;  %v3073_v13 = vld [vmem:[#allocation4 + $0x6a8] sm:$0xf0] }
  0xe5   :  { %1862 = vmatpush.bf16.msra.mxu1 %v2948_v20  ;;  %v3506_v20 = vld [vmem:[#allocation4 + $0x714] sm:$0xf] }
  0xe6   :  { %1839 = vmatmul.bf16.vlgmr.msra.gmra.mxu2 %v3695_v25  ;;  %1850 = vmatpush.bf16.msra.mxu0 %v2876_v30  ;;  %v3523_v25 = vld [vmem:[%s3857_s3 + $0x38] sm:$0xff]  ;;  %v3132_v30 = vor.u32 %v3506_v20, %v3129_v21  ;;  %v3529_v20 = vld [vmem:[%s3857_s3 + $0x68] sm:$0xff] }
  0xe7   :  { %1883 = vmatpush.bf16.msrb.mxu2 %v3116_v14  ;;  %v1555_v14 = vadd.f32 %v3720_v35, %v1542_v4  ;;  %v3520_v35 = vld [vmem:[%s3857_s3 + $0x20] sm:$0xff] }
  0xe8   :  { %1876 = vmatpush.bf16.msra.mxu3 %v3004_v40  ;;  %v3488_v40 = vld [vmem:[#allocation4 + $0x684] sm:$0xf] }
  0xe9   :  { %1863 = vmatpush.bf16.msra.mxu1 %v2940_v44  ;;  %v1568_v27 = vadd.f32 %v3723_v15, %v1555_v14  ;;  %v3519_v15 = vld [vmem:[%s3857_s3 + $0x18] sm:$0xff]  ;;  %v3530_v14 = vld [vmem:[%s3857_s3 + $0x70] sm:$0xff] }
  0xea   :  { %1851 = vmatpush.bf16.msra.mxu0 %v2868_v49  ;;  %v1632_v28 = vpop.f32.mrf.mxu0  ;;  %v3517_v49 = vld [vmem:[%s3857_s3 + $0x8] sm:$0xff] }
  0xeb   :  { %1884 = vmatpush.bf16.msrb.mxu2 %v3108_v32  ;;  %v3057_v32 = vld [vmem:[#allocation4 + $0x688] sm:$0xf0]  ;;  %v1581_v41 = vadd.f32 %v3728_v10, %v1568_v27 }
  0xec   :  { %1877 = vmatpush.bf16.msra.mxu3 %v2996_v53  ;;  %v3060_v17 = vor.u32 %v3488_v40, %v3057_v32  ;;  %v3528_v27 = vld [vmem:[%s3857_s3 + $0x60] sm:$0xff] }
  0xed   :  { %1864 = vmatpush.bf16.msra.mxu1 %v2932_v58  ;;  %1852 = vmatmul.bf16.vlgmr.msra.gmra.mxu0 %v3691_v18  ;;  %v3492_v18 = vld [vmem:[#allocation4 + $0x6a4] sm:$0xf]  ;;  %v1645_v31 = vpop.f32.mrf.mxu1  ;;  %v1594_v5 = vadd.f32 %v3730_v63, %v1581_v41  ;;  %v3524_v41 = vld [vmem:[%s3857_s3 + $0x40] sm:$0xff] }
  0xee   :  { %1898 = vmatpush.bf16.msrb.mxu0 %v3164_v52 }
  0xef   :  { %1885 = vmatpush.bf16.msrb.mxu2 %v3100_v54  ;;  %1878 = vmatmul.bf16.vlgmr.msra.gmra.mxu3 %v3705_v9  ;;  %v3076_v9 = vor.u32 %v3492_v18, %v3073_v13  ;;  %v1607_v39 = vadd.f32 %v3732_v8, %v1594_v5  ;;  %v3531_v18 = vld [vmem:[%s3857_s3 + $0x78] sm:$0xff] }
  0xf0   :  { %1865 = vmatmul.bf16.vlgmr.msra.gmra.mxu1 %v3693_v24  ;;  %v3490_v24 = vld [vmem:[#allocation4 + $0x694] sm:$0xf]  ;;  %2058 = vmatpush.bf16.msrb.mxu3 %v3531_v18  ;;  %v3540_v18 = vld [vmem:[%s3861_s7] sm:$0xff] }
  0xf1   :  { %2045 = vmatpush.bf16.msrb.mxu1 %v3523_v25  ;;  %v3068_v33 = vor.u32 %v3490_v24, %v3065_v23  ;;  %v1658_v43 = vpop.f32.mrf.mxu2  ;;  %v1620_v50 = vadd.f32 %v3734_v19, %v1607_v39 }
  0xf2   :  { %1899 = vmatpush.bf16.msrb.mxu0 %v3156_v62  ;;  %v1671_v44 = vpop.f32.mrf.mxu3  ;;  %v1634_v45 = vpop.f32.mrf.mxu0 }
  0xf3   :  { %1886 = vmatpush.bf16.msrb.mxu2 %v3092_v48  ;;  %v1633_v8 = vadd.f32 %v1632_v28, %v1620_v50 }
  0xf4   :  { %2059 = vmatpush.bf16.msrb.mxu3 %v3530_v14 }
  0xf5   :  { %2046 = vmatpush.bf16.msrb.mxu1 %v3522_v7  ;;  %v1647_v10 = vpop.f32.mrf.mxu1  ;;  %v1646_v52 = vadd.f32 %v1645_v31, %v1633_v8  ;;  %v3526_v31 = vld [vmem:[%s3857_s3 + $0x50] sm:$0xff] }
  0xf6   :  { %1900 = vmatpush.bf16.msrb.mxu0 %v3148_v6 }
  0xf7   :  { %1887 = vmatpush.bf16.msrb.mxu2 %v3084_v11 }
  0xf8   :  { %2060 = vmatpush.bf16.msrb.mxu3 %v3529_v20 }
  0xf9   :  { %2047 = vmatpush.bf16.msrb.mxu1 %v3521_v29  ;;  %v1660_v63 = vpop.f32.mrf.mxu2 }
  0xfa   :  { %1901 = vmatpush.bf16.msrb.mxu0 %v3140_v16  ;;  %v1673_v34 = vpop.f32.mrf.mxu3  ;;  %v332_v16 = vperm.slane %v3739_v36, 1  ;;  %v3527_v36 = vld [vmem:[%s3857_s3 + $0x58] sm:$0xff] }
  0xfb   :  { %1888 = vmatpush.bf16.msrb.mxu2 %v3076_v9 }
  0xfc   :  { %2061 = vmatpush.bf16.msrb.mxu3 %v3528_v27 }
  0xfd   :  { %2048 = vmatpush.bf16.msrb.mxu1 %v3520_v35 }
  0xfe   :  { %1902 = vmatpush.bf16.msrb.mxu0 %v3132_v30 }
  0xff   :  { %1889 = vmatpush.bf16.msrb.mxu2 %v3068_v33 }
 0x100   :  { %2062 = vmatpush.bf16.msrb.mxu3 %v3527_v36 }
 0x101   :  { %2049 = vmatpush.bf16.msrb.mxu1 %v3519_v15 }
 0x102   :  { %1903 = vmatpush.bf16.msrb.mxu0 %v3124_v42 }
 0x103   :  { %1890 = vmatpush.bf16.msrb.mxu2 %v3060_v17 }
 0x104   :  { %2063 = vmatpush.bf16.msrb.mxu3 %v3526_v31 }
 0x105   :  { %3166 = vmatmul.msk.bf16.vlgmr.msrb.gmra.mxu0 %vm1515_vm0, %v3701_v46  ;;  %2050 = vmatpush.bf16.msrb.mxu1 %v3518_v47  ;;  %v1659_v46 = vadd.f32 %v1658_v43, %v1646_v52 }
 0x106   :  { %1891 = vmatmul.bf16.vlgmr.msrb.gmra.mxu2 %v3707_v26 }
 0x107   :  { %v1672_v53 = vadd.f32 %v1671_v44, %v1659_v46  ;;  %v3538_v46 = vld [vmem:[%s3859_s5 + $0x30] sm:$0xff] }
 0x108   :  { %2064 = vmatpush.bf16.msrb.mxu3 %v3525_v37 }
 0x109   :  { %2051 = vmatpush.bf16.msrb.mxu1 %v3517_v49  ;;  %v1710_v54 = vpop.f32.mrf.mxu2 }
 0x10a   :  { %v1684_v55 = vpop.f32.mrf.mxu0 }
 0x10b   :  { %v1685_v56 = vadd.f32 %v1684_v55, %v1672_v53 }
 0x10c   :  { %2065 = vmatpush.bf16.msrb.mxu3 %v3524_v41 }
 0x10d   :  { %2052 = vmatpush.bf16.msrb.mxu1 %v3516_v51  ;;  %v1697_v57 = vpop.f32.mrf.mxu1  ;;  %v3539_v51 = vld [vmem:[%s3859_s5 + $0x38] sm:$0xff] }
 0x10e   :  { %v1698_v58 = vadd.f32 %v1697_v57, %v1685_v56  ;;  %2141 = vmatpush.bf16.msra.mxu0 %v3539_v51  ;;  %v3537_v56 = vld [vmem:[%s3859_s5 + $0x28] sm:$0xff] }
 0x110   :  { %v1711_v26 = vadd.f32 %v1710_v54, %v1698_v58 }
 0x111   :  { %v1712_v59 = vpop.f32.mrf.mxu2 }
 0x112   :  { %v1723_v60 = vpop.f32.mrf.mxu3  ;;  %v1909_v61 = vmax.f32 %v1711_v26, 0.0  ;;  %v1686_v19 = vpop.f32.mrf.mxu0  ;;  %2142 = vmatpush.bf16.msra.mxu0 %v3538_v46  ;;  %v3536_v59 = vld [vmem:[%s3859_s5 + $0x20] sm:$0xff] }
 0x113   :  { %v1724_v23 = vadd.f32 %v1723_v60, %v332_v16  ;;  %v3535_v60 = vld [vmem:[%s3859_s5 + $0x18] sm:$0xff] }
 0x114   :  { %v1911_v25 = vpack.c.bf16 %v1909_v61, %v1909_v61  ;;  %v3534_v61 = vld [vmem:[%s3859_s5 + $0x10] sm:$0xff] }
 0x115   :  { %v1699_v62 = vpop.f32.mrf.mxu1 }
 0x116   :  { %2053 = vmatmul.bf16.vlgmr.msrb.gmra.mxu1 %v1911_v25  ;;  %2143 = vmatpush.bf16.msra.mxu0 %v3537_v56  ;;  %v3533_v62 = vld [vmem:[%s3859_s5 + $0x8] sm:$0xff] }
 0x11a   :  { %v1725_v48 = vpop.f32.mrf.mxu3  ;;  %2144 = vmatpush.bf16.msra.mxu0 %v3536_v59 }
 0x11b   :  { %v3532_v48 = vld [vmem:[%s3859_s5] sm:$0xff] }
 0x11e   :  { %2145 = vmatpush.bf16.msra.mxu0 %v3535_v60 }
 0x122   :  { %2146 = vmatpush.bf16.msra.mxu0 %v3534_v61 }
 0x126   :  { %2147 = vmatpush.bf16.msra.mxu0 %v3533_v62 }
 0x129   :  { %v1736_v0 = vpop.f32.mrf.mxu2 }
 0x12a   :  { %v1749_v1 = vpop.f32.mrf.mxu0  ;;  %v1737_v28 = vadd.f32 %v1736_v0, %v1724_v23  ;;  %2148 = vmatpush.bf16.msra.mxu0 %v3532_v48  ;;  %v3543_v0 = vld [vmem:[%s3861_s7 + $0x18] sm:$0xff] }
 0x12b   :  { %2200 = vmatpush.bf16.msra.mxu2 %v3543_v0 }
 0x12c   :  { %v1750_v30 = vadd.f32 %v1749_v1, %v1737_v28  ;;  %v3542_v1 = vld [vmem:[%s3861_s7 + $0x10] sm:$0xff] }
 0x12d   :  { %v1762_v2 = vpop.f32.mrf.mxu1 }
 0x12e   :  { %v1763_v33 = vadd.f32 %v1762_v2, %v1750_v30  ;;  %v3541_v2 = vld [vmem:[%s3861_s7 + $0x8] sm:$0xff] }
 0x12f   :  { %2201 = vmatpush.bf16.msra.mxu2 %v3542_v1 }
 0x131   :  { %v1738_v3 = vpop.f32.mrf.mxu2 }
 0x132   :  { %v1775_v4 = vpop.f32.mrf.mxu3  ;;  %v1751_v7 = vpop.f32.mrf.mxu0  ;;  %v3548_v3 = vld [vmem:[%s3858_s4] ss:$0 sm:$0xff] }
 0x133   :  { %v1776_v38 = vadd.f32 %v1775_v4, %v1763_v33  ;;  %2202 = vmatpush.bf16.msra.mxu2 %v3541_v2 }
 0x135   :  { %v1764_v6 = vpop.f32.mrf.mxu1 }
 0x137   :  { %2203 = vmatpush.bf16.msra.mxu2 %v3540_v18 }
 0x13a   :  { %v1777_v11 = vpop.f32.mrf.mxu3 }
 0x149   :  { %v1788_v12 = vpop.f32.mrf.mxu2 }
 0x14a   :  { %v1801_v22 = vpop.f32.mrf.mxu0  ;;  %v1789_v15 = vadd.f32 %v1788_v12, %v1776_v38 }
 0x14c   :  { %v1802_v43 = vadd.f32 %v1801_v22, %v1789_v15 }
 0x14d   :  { %v1814_v13 = vpop.f32.mrf.mxu1 }
 0x14e   :  { %v1815_v45 = vadd.f32 %v1814_v13, %v1802_v43  ;;  %v3549_v13 = vld [vmem:[%s3860_s6] ss:$0 sm:$0xff] }
 0x151   :  { %v1790_v29 = vpop.f32.mrf.mxu2 }
 0x152   :  { %v1827_v9 = vpop.f32.mrf.mxu3  ;;  %v1803_v21 = vpop.f32.mrf.mxu0 }
 0x153   :  { %v1828_v10 = vadd.f32 %v1827_v9, %v1815_v45  ;;  %v3550_v21 = vld [vmem:[%s3862_s8] ss:$0 sm:$0xff] }
 0x155   :  { %v1816_v24 = vpop.f32.mrf.mxu1 }
 0x15a   :  { %v1829_v35 = vpop.f32.mrf.mxu3 }
 0x169   :  { %v1840_v40 = vpop.f32.mrf.mxu2 }
 0x16a   :  { %v1853_v32 = vpop.f32.mrf.mxu0  ;;  %v1841_v49 = vadd.f32 %v1840_v40, %v1828_v10 }
 0x16c   :  { %v1854_v63 = vadd.f32 %v1853_v32, %v1841_v49 }
 0x16d   :  { %v1866_v42 = vpop.f32.mrf.mxu1 }
 0x16e   :  { %v1867_v50 = vadd.f32 %v1866_v42, %v1854_v63 }
 0x171   :  { %v1842_v17 = vpop.f32.mrf.mxu2 }
 0x172   :  { %v1879_v44 = vpop.f32.mrf.mxu3  ;;  %v1855_v5 = vpop.f32.mrf.mxu0 }
 0x173   :  { %v1880_v8 = vadd.f32 %v1879_v44, %v1867_v50 }
 0x175   :  { %v1868_v47 = vpop.f32.mrf.mxu1 }
 0x17a   :  { %v1881_v39 = vpop.f32.mrf.mxu3 }
 0x182   :  { %v1905_v34 = vpop.f32.mrf.mxu0 }
 0x189   :  { %v1892_v52 = vpop.f32.mrf.mxu2 }
 0x18a   :  { %v1893_v53 = vadd.f32 %v1892_v52, %v1880_v8  ;;  %v1907_v54 = vpop.f32.mrf.mxu0 }
 0x18c   :  { %v1906_v55 = vadd.f32 %v1905_v34, %v1893_v53 }
 0x18e   :  { %v1910_v57 = vmax.f32 %v1906_v55, 0.0 }
 0x190   :  { %v1912_v58 = vpack.c.bf16 %v1910_v57, %v1910_v57 }
 0x191   :  { %v1894_v26 = vpop.f32.mrf.mxu2 }
 0x192   :  { %2066 = vmatmul.bf16.vlgmr.msrb.gmra.mxu3 %v1912_v58 }
 0x193   :  { %v2054_v19 = vpop.f32.mrf.mxu1 }
 0x194   :  { %v2055_v4 = vadd.f32 %v3548_v3, %v2054_v19 }
 0x19b   :  { %v2056_v25 = vpop.f32.mrf.mxu1 }
 0x215   :  { %v2067_v7 = vpop.f32.mrf.mxu3 }
 0x216   :  { %v2068_v6 = vadd.f32 %v2067_v7, %v2055_v4 }
 0x218   :  { %v2071_v11 = vmax.f32 %v2068_v6, 0.0 }
 0x21a   :  { %v2072_v12 = vpack.c.bf16 %v2071_v11, %v2071_v11 }
 0x21c   :  { %2149 = vmatmul.bf16.vlgmr.msra.gmra.mxu0 %v2072_v12 }
 0x21d   :  { %v2069_v22 = vpop.f32.mrf.mxu3 }
 0x299   :  { %v2150_v14 = vpop.f32.mrf.mxu0 }
 0x29a   :  { %v2151_v29 = vadd.f32 %v3549_v13, %v2150_v14 }
 0x29c   :  { %v2154_v16 = vmax.f32 %v2151_v29, 0.0 }
 0x29e   :  { %v2155_v9 = vpack.c.bf16 %v2154_v16, %v2154_v16 }
 0x2a0   :  { %3279 = vmatmul.msk.bf16.vlgmr.msra.gmra.mxu2 %vm2192_vm1, %v2155_v9 }
 0x2a1   :  { %v2152_v20 = vpop.f32.mrf.mxu0 }
 0x323   :  { %v2205_v24 = vpop.f32.mrf.mxu2 }
 0x324   :  { %v2206_v23 = vadd.f32 %v3550_v21, %v2205_v24 }
 0x326   :  { %v2209_v27 = vmul.f32 0.5, %v2206_v23 }
 0x328   :  { %3551 = vtanh.f32 %v2209_v27 }
 0x32b   :  { %v2207_v28 = vpop.f32.mrf.mxu2 }
 0x32e   :  { %v3552_v35 = vpop.eup %3551 }
 0x32f   :  { %v2211_v36 = vadd.f32 1.0, %v3552_v35 }
 0x331   :  { %v2212_v30 = vmul.f32 0.5, %v2211_v36 }
 0x333   :  { %2214 = vst.msk [vmem:[%s3863_s9] sm:$0xff] %vm2213_vm2, %v2212_v30 }
 0x334   :  { %2219 = vsyncpa [#allocation3], 1 }
 0x335   :  { %2220 = vsyncpa [#allocation5], 1 }

</bundles_post_ra>
